<compile_context>
chip_gen: v7x
topology: tpu7x:2x2x1
jax: 0.10.0
libtpu: 0.0.40
codegen_flags: <defaults>
</compile_context>

<pallas_src>
import math
import functools

import jax
import jax.numpy as jnp
from jax.experimental import pallas as pl
from jax.experimental.pallas import tpu as pltpu

HI = jax.lax.Precision.HIGHEST
LANE = 128
RSQRT2 = math.sqrt(0.5)


def _round_up(n, m):
    return (n + m - 1) // m * m


# ----------------------------------------------------------------------------
# Fused Pallas kernel: first_layer -> n_layers resblocks -> head
# ----------------------------------------------------------------------------
def _fused_kernel(x_ref, wf_ref, vecs_ref, wconv_ref, bout_ref, wos_ref,
                  w1_ref, w2_ref, b2_ref, o_ref, xpad_scr,
                  *, T, Cin, Cp, Cout, K, dilations, halo, slope):
    # x_ref:      (1, T, Cin)        narrow f32 input (no lane padding)
    # wf_ref:     (Cin, Cp)          first 1x1 conv weights (f32, VPU path)
    # vecs_ref:   (4, Cp)            row0=bf, row1=skips_bias, row2=b1_eff
    # wconv_ref:  (L, K, Cp, Cp)     bf16, one slab per dilated tap
    # bout_ref:   (L, Cp)            per-layer residual bias (conv bias folded)
    # wos_ref:    (L, Cp, 2*Cp)      bf16 [wout*sqrt(.5) | wskip*bn1*skip_scale]
    # xpad_scr:   (T + 2*halo, Cp)   bf16 VMEM scratch; halo rows stay zero
    BF = jnp.bfloat16

    # Zero only the halo rows (never written; interior rows are overwritten
    # every layer).  Done every grid step -> safe under megacore grid sharding.
    zrows = jnp.zeros((halo, Cp), BF)
    xpad_scr[0:halo, :] = zrows
    xpad_scr[halo + T:halo + T + halo, :] = zrows

    # first_layer: 1x1 conv from the narrow input, as Cin VPU multiply-adds
    # (MXU would waste >95% of the array on a 4-deep contraction).
    xin = x_ref[0]                                        # (T, Cin) f32
    y = jnp.zeros((T, Cp), jnp.float32) + vecs_ref[0:1, :]
    for c in range(Cin):
        y = y + xin[:, c:c + 1] * wf_ref[c:c + 1, :]

    skips = jnp.zeros((T, Cp), jnp.float32)

    for l, d in enumerate(dilations):                     # static unroll
        pad = (K - 1) // 2 * d
        xpad_scr[halo:halo + T, :] = y.astype(BF)         # aligned bf16 store
        # Dilated conv: accumulate K taps directly (no (T, K*C) concat slab).
        # TODO(synk): if bundle dumps show ld/st as the binding slot, move the
        # +-d shifts to the XLU via pltpu.roll and mask the halo rows instead.
        h = None
        for j in range(K):
            s = halo - pad + j * d
            t = jnp.dot(xpad_scr[s:s + T, :], wconv_ref[l, j],
                        preferred_element_type=jnp.float32)
            h = t if h is None else h + t
        # Dropout == identity in eval mode; conv bias folded into bout / skips_bias.
        # Fused out/skip 1x1 convs: one (T, 2C) matmul split on a lane boundary.
        res = jnp.dot(h.astype(BF), wos_ref[l], preferred_element_type=jnp.float32)
        skips = skips + res[:, Cp:]
        y = res[:, :Cp] + bout_ref[l:l + 1, :] + y * RSQRT2   # sqrt(.5) pre-folded

    # Head.  BN1 (+skip_scale) folded into wskip/skips_bias; BN2 folded into w1/b1.
    h = skips + vecs_ref[1:2, :]
    h = jnp.where(h >= 0, h, slope * h)
    h = jnp.dot(h.astype(BF), w1_ref[...], preferred_element_type=jnp.float32) + vecs_ref[2:3, :]
    h = jnp.where(h >= 0, h, slope * h)
    out = jnp.dot(h.astype(BF), w2_ref[...], preferred_element_type=jnp.float32) + b2_ref[...]
    o_ref[0] = out[:, :Cout]                               # narrow f32 writeback


# ----------------------------------------------------------------------------
# One-time parameter packing (transpose / pad / fold consts / bf16 cast)
# ----------------------------------------------------------------------------
def pack_params(params, cfg):
    C, Cin, Cout = cfg["inner_channels"], cfg["in_channels"], cfg["out_channels"]
    K, L = cfg["kernel_size"], cfg["n_layers"]
    Cp, Coutp = _round_up(C, LANE), _round_up(Cout, LANE)
    eps = 1e-5
    f32, bf16 = jnp.float32, jnp.bfloat16

    def pad_mat(w, rows, cols, dtype):
        return jnp.pad(w, ((0, rows - w.shape[0]), (0, cols - w.shape[1]))).astype(dtype)

    def pad_row(v, n):
        return jnp.pad(v, (0, n - v.shape[0]))

    skip_scale = math.sqrt(1.0 / L)
    bn1_scale = params["bn1_gamma"] / jnp.sqrt(params["bn1_var"] + eps)
    bn1_shift = params["bn1_beta"] - params["bn1_mean"] * bn1_scale
    bn2_scale = params["bn2_gamma"] / jnp.sqrt(params["bn2_var"] + eps)
    bn2_shift = params["bn2_beta"] - params["bn2_mean"] * bn2_scale
    sfac = bn1_scale * skip_scale            # folded into every skip-path output

    wconv_all, wos_all, bout_all = [], [], []
    skips_bias = bn1_shift                   # BN1 shift + folded skip biases
    for lp in params["layers"]:
        # (Cout, Cin, K) -> per-tap (Cin_pad, Cout_pad) bf16 slabs.
        taps = jnp.stack([pad_mat(lp["wconv"][:, :, j].T, Cp, Cp, bf16)
                          for j in range(K)])
        wconv_all.append(taps)                               # (K, Cp, Cp)
        wo = pad_mat(lp["wout"].T * RSQRT2, Cp, Cp, bf16)    # sqrt(0.5) folded
        ws = pad_mat(lp["wskip"].T * sfac[None, :], Cp, Cp, bf16)  # BN1*skip_scale folded
        wos_all.append(jnp.concatenate([wo, ws], axis=1))    # (Cp, 2*Cp)
        # conv bias folded through the 1x1 convs (h itself never needs it):
        bout_all.append(pad_row((lp["wout"] @ lp["bconv"] + lp["bout"]) * RSQRT2, Cp))
        skips_bias = skips_bias + (lp["wskip"] @ lp["bconv"] + lp["bskip"]) * sfac

    vecs = jnp.zeros((4, Cp), f32)
    vecs = vecs.at[0, :C].set(params["bf"])
    vecs = vecs.at[1, :C].set(skips_bias)
    vecs = vecs.at[2, :C].set(params["b1"] * bn2_scale + bn2_shift)  # BN2 folded

    packed = {
        "wf": pad_mat(params["wf"].T, Cin, Cp, f32),   # (Cin, Cp), VPU path
        "vecs": vecs,                                  # (4, Cp) f32
        "wconv": jnp.stack(wconv_all),                 # (L, K, Cp, Cp) bf16
        "bout": jnp.stack(bout_all),                   # (L, Cp) f32
        "wos": jnp.stack(wos_all),                     # (L, Cp, 2*Cp) bf16
        "w1": pad_mat(params["w1"].T * bn2_scale[None, :], Cp, Cp, bf16),
        "w2": pad_mat(params["w2"].T, Cp, Coutp, bf16),
        "b2": pad_row(params["b2"], Coutp).reshape(1, Coutp).astype(f32),
    }
    return packed


# ----------------------------------------------------------------------------
# Forward wrapper
# ----------------------------------------------------------------------------
def wavenet_discriminator_forward(x_bct, packed, cfg):
    """x_bct: (B, in_channels, T) PyTorch layout. Returns (B, out_channels, T)."""
    B, Cin, T = x_bct.shape
    C, Cout = cfg["inner_channels"], cfg["out_channels"]
    K, L = cfg["kernel_size"], cfg["n_layers"]
    Cp, Coutp = _round_up(C, LANE), _round_up(Cout, LANE)
    layers_per_stack = L // cfg["n_stacks"]
    dilations = tuple(2 ** (i % layers_per_stack) for i in range(L))
    max_pad = (K - 1) // 2 * max(dilations)
    halo = _round_up(max(max_pad, 1), 16)          # bf16-tile-aligned interior offset

    x = jnp.transpose(x_bct, (0, 2, 1))            # (B, T, Cin) -- no 128-lane pad

    kern = functools.partial(_fused_kernel, T=T, Cin=Cin, Cp=Cp, Cout=Cout, K=K,
                             dilations=dilations, halo=halo, slope=0.2)

    def full(shape):
        return pl.BlockSpec(shape, lambda i, _n=len(shape): (0,) * _n)

    # VMEM budget: weights (double-buffered worst case) + activations + scratch,
    # with headroom; clamped well below physical VMEM on all chips.
    weight_bytes = sum(int(v.size) * v.dtype.itemsize for v in packed.values())
    act_bytes = (T + 2 * halo) * Cp * 2 + 10 * T * Cp * 4 + 2 * T * (Cin + Cout) * 4
    vmem_limit = int(min(max(2 * (weight_bytes + act_bytes), 32 << 20), 100 << 20))

    # TODO(synk): for very long T (5-10k+) add a time-tile grid axis with a
    # receptive-field recompute halo so the working set fits v7x's 64 MiB VMEM
    # (and both its TensorCores stay busy at batch=1); single-buffer the
    # grid-invariant weight specs (pipeline_mode=pl.Buffered(1)) at that point.
    out = pl.pallas_call(
        kern,
        grid=(B,),
        in_specs=[
            pl.BlockSpec((1, T, Cin), lambda i: (i, 0, 0)),
            full((Cin, Cp)), full((4, Cp)),
            full((L, K, Cp, Cp)), full((L, Cp)), full((L, Cp, 2 * Cp)),
            full((Cp, Cp)), full((Cp, Coutp)), full((1, Coutp)),
        ],
        out_specs=pl.BlockSpec((1, T, Cout), lambda i: (i, 0, 0)),
        out_shape=jax.ShapeDtypeStruct((B, T, Cout), jnp.float32),
        scratch_shapes=[pltpu.VMEM((T + 2 * halo, Cp), jnp.bfloat16)],
        compiler_params=pltpu.CompilerParams(
            dimension_semantics=("parallel",),
            vmem_limit_bytes=vmem_limit),
    )(x, packed["wf"], packed["vecs"],
      packed["wconv"], packed["bout"], packed["wos"],
      packed["w1"], packed["w2"], packed["b2"])

    return jnp.transpose(out, (0, 2, 1))           # (B, Cout, T)


# ----------------------------------------------------------------------------
# Pure-JAX reference (unfused, f32, same math as the PyTorch module in eval)
# ----------------------------------------------------------------------------
def _ref_dilated_conv(x, w, b, dilation):
    B, T, C = x.shape
    K = w.shape[2]
    pad = (K - 1) // 2 * dilation
    xp = jnp.pad(x, ((0, 0), (pad, pad), (0, 0)))
    y = jnp.zeros((B, T, w.shape[0]), jnp.float32)
    for j in range(K):
        y = y + jnp.einsum("btc,oc->bto",
                           xp[:, j * dilation: j * dilation + T, :],
                           w[:, :, j], precision=HI)
    return y + b


def reference_forward(x_bct, params, cfg):
    x = jnp.transpose(x_bct, (0, 2, 1))
    y = jnp.einsum("btc,oc->bto", x, params["wf"], precision=HI) + params["bf"]
    skips = jnp.zeros_like(y)
    layers_per_stack = cfg["n_layers"] // cfg["n_stacks"]
    for i, lp in enumerate(params["layers"]):
        dilation = 2 ** (i % layers_per_stack)
        h = _ref_dilated_conv(y, lp["wconv"], lp["bconv"], dilation)
        skip = jnp.einsum("btc,oc->bto", h, lp["wskip"], precision=HI) + lp["bskip"]
        y = (jnp.einsum("btc,oc->bto", h, lp["wout"], precision=HI)
             + lp["bout"] + y) * math.sqrt(0.5)
        skips = skips + skip
    h = skips * math.sqrt(1.0 / cfg["n_layers"])
    eps = 1e-5
    h = (h - params["bn1_mean"]) / jnp.sqrt(params["bn1_var"] + eps) * params["bn1_gamma"] + params["bn1_beta"]
    h = jnp.where(h >= 0, h, 0.2 * h)
    h = jnp.einsum("btc,oc->bto", h, params["w1"], precision=HI) + params["b1"]
    h = (h - params["bn2_mean"]) / jnp.sqrt(params["bn2_var"] + eps) * params["bn2_gamma"] + params["bn2_beta"]
    h = jnp.where(h >= 0, h, 0.2 * h)
    y = jnp.einsum("btc,oc->bto", h, params["w2"], precision=HI) + params["b2"]
    return jnp.transpose(y, (0, 2, 1))


# ----------------------------------------------------------------------------
# Deterministic parameter construction
# ----------------------------------------------------------------------------
def make_params(key, cfg):
    n_layers = cfg["n_layers"]
    Cin, C, Cout, K = (cfg["in_channels"], cfg["inner_channels"],
                       cfg["out_channels"], cfg["kernel_size"])

    keys = iter(jax.random.split(key, 16 + 8 * n_layers))

    def w(shape, scale=0.1):
        return scale * jax.random.normal(next(keys), shape, jnp.float32)

    params = {
        "wf": w((C, Cin)), "bf": w((C,)),
        "layers": [],
        "bn1_gamma": 1.0 + w((C,)), "bn1_beta": w((C,)),
        "bn1_mean": w((C,)), "bn1_var": 1.0 + jnp.abs(w((C,))),
        "w1": w((C, C)), "b1": w((C,)),
        "bn2_gamma": 1.0 + w((C,)), "bn2_beta": w((C,)),
        "bn2_mean": w((C,)), "bn2_var": 1.0 + jnp.abs(w((C,))),
        "w2": w((Cout, C)), "b2": w((Cout,)),
    }
    for _ in range(n_layers):
        params["layers"].append({
            "wconv": w((C, C, K)), "bconv": w((C,)),
            "wout": w((C, C)), "bout": w((C,)),
            "wskip": w((C, C)), "bskip": w((C,)),
        })
    return params


# ----------------------------------------------------------------------------
if __name__ == "__main__":
    cfg = dict(n_layers=4, n_stacks=2, in_channels=4, inner_channels=32,
               out_channels=4, kernel_size=3, dropout=0.0)
    B, T = 2, 64

    key = jax.random.PRNGKey(0)
    k_x, k_p = jax.random.split(key)
    x = jax.random.normal(k_x, (B, cfg["in_channels"], T), jnp.float32)  # (B, C, T)
    params = make_params(k_p, cfg)
    packed = pack_params(params, cfg)          # one-time prep, outside the hot path

    fwd = jax.jit(functools.partial(wavenet_discriminator_forward, cfg=cfg))
    out = jax.block_until_ready(fwd(x, packed))

    ref = jax.block_until_ready(reference_forward(x, params, cfg))
    assert out.shape == (B, cfg["out_channels"], T), out.shape
    err = float(jnp.max(jnp.abs(out - ref)))
    # bf16 MXU operands with f32 accumulation: tolerance loosened accordingly.
    assert jnp.allclose(out, ref, rtol=2e-2, atol=2e-2), err

    print("KERNEL_OK")
</pallas_src>

<mosaic_0001>
module attributes {stable_mosaic.version = 11 : i64} {
  func.func @_fused_kernel(%arg0: i32, %arg1: memref<1x64x4xf32, #tpu.memory_space<vmem>>, %arg2: memref<4x128xf32, #tpu.memory_space<vmem>>, %arg3: memref<4x128xf32, #tpu.memory_space<vmem>>, %arg4: memref<4x3x128x128xbf16, #tpu.memory_space<vmem>>, %arg5: memref<4x128xf32, #tpu.memory_space<vmem>>, %arg6: memref<4x128x256xbf16, #tpu.memory_space<vmem>>, %arg7: memref<128x128xbf16, #tpu.memory_space<vmem>>, %arg8: memref<128x128xbf16, #tpu.memory_space<vmem>>, %arg9: memref<1x128xf32, #tpu.memory_space<vmem>>, %arg10: memref<1x64x4xf32, #tpu.memory_space<vmem>>, %arg11: memref<96x128xbf16, #tpu.memory_space<vmem>>) attributes {dimension_semantics = [#tpu.dimension_semantics<parallel>], iteration_bounds = array<i64: 2>, scalar_prefetch = 0 : i64, scratch_operands = 1 : i64, tpu.core_type = #tpu.core_type<tc>, window_params = [{transform_indices = @transform_0, window_bounds = array<i64: 1, 64, 4>}, {pipeline_mode = #tpu.pipeline_mode<synchronous>, transform_indices = @transform_1, window_bounds = array<i64: 4, 128>}, {pipeline_mode = #tpu.pipeline_mode<synchronous>, transform_indices = @transform_2, window_bounds = array<i64: 4, 128>}, {pipeline_mode = #tpu.pipeline_mode<synchronous>, transform_indices = @transform_3, window_bounds = array<i64: 4, 3, 128, 128>}, {pipeline_mode = #tpu.pipeline_mode<synchronous>, transform_indices = @transform_4, window_bounds = array<i64: 4, 128>}, {pipeline_mode = #tpu.pipeline_mode<synchronous>, transform_indices = @transform_5, window_bounds = array<i64: 4, 128, 256>}, {pipeline_mode = #tpu.pipeline_mode<synchronous>, transform_indices = @transform_6, window_bounds = array<i64: 128, 128>}, {pipeline_mode = #tpu.pipeline_mode<synchronous>, transform_indices = @transform_7, window_bounds = array<i64: 128, 128>}, {pipeline_mode = #tpu.pipeline_mode<synchronous>, transform_indices = @transform_8, window_bounds = array<i64: 1, 128>}, {transform_indices = @transform_9, window_bounds = array<i64: 1, 64, 4>}]} {
    %cst = arith.constant 0.000000e+00 : bf16
    %0 = vector.broadcast %cst : bf16 to vector<16x128xbf16>
    %c0 = arith.constant 0 : index
    %c0_0 = arith.constant 0 : index
    %1 = vector.load %arg11[%c0, %c0_0] : memref<96x128xbf16, #tpu.memory_space<vmem>>, vector<16x128xbf16>
    tpu.vector_store %arg11[%c0, %c0_0], %0 {strides = array<i32>} : memref<96x128xbf16, #tpu.memory_space<vmem>>, vector<16x128xbf16>,
    %c80 = arith.constant 80 : index
    %c0_1 = arith.constant 0 : index
    %2 = vector.load %arg11[%c80, %c0_1] : memref<96x128xbf16, #tpu.memory_space<vmem>>, vector<16x128xbf16>
    tpu.vector_store %arg11[%c80, %c0_1], %0 {strides = array<i32>} : memref<96x128xbf16, #tpu.memory_space<vmem>>, vector<16x128xbf16>,
    %c0_2 = arith.constant 0 : index
    %c0_3 = arith.constant 0 : index
    %c0_4 = arith.constant 0 : index
    %3 = vector.load %arg1[%c0_2, %c0_3, %c0_4] : memref<1x64x4xf32, #tpu.memory_space<vmem>>, vector<1x64x4xf32>
    %4 = vector.shape_cast %3 : vector<1x64x4xf32> to vector<64x4xf32>
    %cst_5 = arith.constant 0.000000e+00 : f32
    %5 = vector.broadcast %cst_5 : f32 to vector<64x128xf32>
    %c0_6 = arith.constant 0 : index
    %c0_7 = arith.constant 0 : index
    %6 = vector.load %arg3[%c0_6, %c0_7] : memref<4x128xf32, #tpu.memory_space<vmem>>, vector<1x128xf32>
    %7 = vector.broadcast %6 : vector<1x128xf32> to vector<64x128xf32>
    %8 = arith.addf %5, %7 : vector<64x128xf32>
    %9 = vector.extract_strided_slice %4 {offsets = [0, 0], sizes = [64, 1], strides = [1, 1]} : vector<64x4xf32> to vector<64x1xf32>
    %c0_8 = arith.constant 0 : index
    %c0_9 = arith.constant 0 : index
    %10 = vector.load %arg2[%c0_8, %c0_9] : memref<4x128xf32, #tpu.memory_space<vmem>>, vector<1x128xf32>
    %11 = vector.broadcast %9 : vector<64x1xf32> to vector<64x128xf32>
    %12 = vector.broadcast %10 : vector<1x128xf32> to vector<64x128xf32>
    %13 = arith.mulf %11, %12 : vector<64x128xf32>
    %14 = arith.addf %8, %13 : vector<64x128xf32>
    %15 = vector.extract_strided_slice %4 {offsets = [0, 1], sizes = [64, 1], strides = [1, 1]} : vector<64x4xf32> to vector<64x1xf32>
    %c1 = arith.constant 1 : index
    %c0_10 = arith.constant 0 : index
    %16 = vector.load %arg2[%c1, %c0_10] : memref<4x128xf32, #tpu.memory_space<vmem>>, vector<1x128xf32>
    %17 = vector.broadcast %15 : vector<64x1xf32> to vector<64x128xf32>
    %18 = vector.broadcast %16 : vector<1x128xf32> to vector<64x128xf32>
    %19 = arith.mulf %17, %18 : vector<64x128xf32>
    %20 = arith.addf %14, %19 : vector<64x128xf32>
    %21 = vector.extract_strided_slice %4 {offsets = [0, 2], sizes = [64, 1], strides = [1, 1]} : vector<64x4xf32> to vector<64x1xf32>
    %c2 = arith.constant 2 : index
    %c0_11 = arith.constant 0 : index
    %22 = vector.load %arg2[%c2, %c0_11] : memref<4x128xf32, #tpu.memory_space<vmem>>, vector<1x128xf32>
    %23 = vector.broadcast %21 : vector<64x1xf32> to vector<64x128xf32>
    %24 = vector.broadcast %22 : vector<1x128xf32> to vector<64x128xf32>
    %25 = arith.mulf %23, %24 : vector<64x128xf32>
    %26 = arith.addf %20, %25 : vector<64x128xf32>
    %27 = vector.extract_strided_slice %4 {offsets = [0, 3], sizes = [64, 1], strides = [1, 1]} : vector<64x4xf32> to vector<64x1xf32>
    %c3 = arith.constant 3 : index
    %c0_12 = arith.constant 0 : index
    %28 = vector.load %arg2[%c3, %c0_12] : memref<4x128xf32, #tpu.memory_space<vmem>>, vector<1x128xf32>
    %29 = vector.broadcast %27 : vector<64x1xf32> to vector<64x128xf32>
    %30 = vector.broadcast %28 : vector<1x128xf32> to vector<64x128xf32>
    %31 = arith.mulf %29, %30 : vector<64x128xf32>
    %32 = arith.addf %26, %31 : vector<64x128xf32>
    %cst_13 = arith.constant 0.000000e+00 : f32
    %33 = vector.broadcast %cst_13 : f32 to vector<64x128xf32>
    %34 = arith.truncf %32 : vector<64x128xf32> to vector<64x128xbf16>
    %c16 = arith.constant 16 : index
    %c0_14 = arith.constant 0 : index
    %35 = vector.load %arg11[%c16, %c0_14] : memref<96x128xbf16, #tpu.memory_space<vmem>>, vector<64x128xbf16>
    tpu.vector_store %arg11[%c16, %c0_14], %34 {strides = array<i32>} : memref<96x128xbf16, #tpu.memory_space<vmem>>, vector<64x128xbf16>,
    %c15 = arith.constant 15 : index
    %c0_15 = arith.constant 0 : index
    %36 = vector.load %arg11[%c15, %c0_15] : memref<96x128xbf16, #tpu.memory_space<vmem>>, vector<64x128xbf16>
    %c0_16 = arith.constant 0 : index
    %c0_17 = arith.constant 0 : index
    %c0_18 = arith.constant 0 : index
    %c0_19 = arith.constant 0 : index
    %37 = vector.load %arg4[%c0_16, %c0_17, %c0_18, %c0_19] : memref<4x3x128x128xbf16, #tpu.memory_space<vmem>>, vector<1x1x128x128xbf16>
    %38 = vector.shape_cast %37 : vector<1x1x128x128xbf16> to vector<128x128xbf16>
    %cst_20 = arith.constant dense<0.000000e+00> : vector<64x128xf32>
    %39 = tpu.matmul %36, %38, %cst_20 {dimension_numbers = #tpu.dot_dimension_numbers<[1], [0], [0], [1], [0, 0, 1, 1], [], []>} : vector<64x128xbf16>, vector<128x128xbf16>, vector<64x128xf32> -> vector<64x128xf32>
    %c16_21 = arith.constant 16 : index
    %c0_22 = arith.constant 0 : index
    %40 = vector.load %arg11[%c16_21, %c0_22] : memref<96x128xbf16, #tpu.memory_space<vmem>>, vector<64x128xbf16>
    %c0_23 = arith.constant 0 : index
    %c1_24 = arith.constant 1 : index
    %c0_25 = arith.constant 0 : index
    %c0_26 = arith.constant 0 : index
    %41 = vector.load %arg4[%c0_23, %c1_24, %c0_25, %c0_26] : memref<4x3x128x128xbf16, #tpu.memory_space<vmem>>, vector<1x1x128x128xbf16>
    %42 = vector.shape_cast %41 : vector<1x1x128x128xbf16> to vector<128x128xbf16>
    %cst_27 = arith.constant dense<0.000000e+00> : vector<64x128xf32>
    %43 = tpu.matmul %40, %42, %cst_27 {dimension_numbers = #tpu.dot_dimension_numbers<[1], [0], [0], [1], [0, 0, 1, 1], [], []>} : vector<64x128xbf16>, vector<128x128xbf16>, vector<64x128xf32> -> vector<64x128xf32>
    %44 = arith.addf %39, %43 : vector<64x128xf32>
    %c17 = arith.constant 17 : index
    %c0_28 = arith.constant 0 : index
    %45 = vector.load %arg11[%c17, %c0_28] : memref<96x128xbf16, #tpu.memory_space<vmem>>, vector<64x128xbf16>
    %c0_29 = arith.constant 0 : index
    %c2_30 = arith.constant 2 : index
    %c0_31 = arith.constant 0 : index
    %c0_32 = arith.constant 0 : index
    %46 = vector.load %arg4[%c0_29, %c2_30, %c0_31, %c0_32] : memref<4x3x128x128xbf16, #tpu.memory_space<vmem>>, vector<1x1x128x128xbf16>
    %47 = vector.shape_cast %46 : vector<1x1x128x128xbf16> to vector<128x128xbf16>
    %cst_33 = arith.constant dense<0.000000e+00> : vector<64x128xf32>
    %48 = tpu.matmul %45, %47, %cst_33 {dimension_numbers = #tpu.dot_dimension_numbers<[1], [0], [0], [1], [0, 0, 1, 1], [], []>} : vector<64x128xbf16>, vector<128x128xbf16>, vector<64x128xf32> -> vector<64x128xf32>
    %49 = arith.addf %44, %48 : vector<64x128xf32>
    %50 = arith.truncf %49 : vector<64x128xf32> to vector<64x128xbf16>
    %c0_34 = arith.constant 0 : index
    %c0_35 = arith.constant 0 : index
    %c0_36 = arith.constant 0 : index
    %51 = vector.load %arg6[%c0_34, %c0_35, %c0_36] : memref<4x128x256xbf16, #tpu.memory_space<vmem>>, vector<1x128x256xbf16>
    %52 = vector.shape_cast %51 : vector<1x128x256xbf16> to vector<128x256xbf16>
    %cst_37 = arith.constant dense<0.000000e+00> : vector<64x256xf32>
    %53 = tpu.matmul %50, %52, %cst_37 {dimension_numbers = #tpu.dot_dimension_numbers<[1], [0], [0], [1], [0, 0, 1, 1], [], []>} : vector<64x128xbf16>, vector<128x256xbf16>, vector<64x256xf32> -> vector<64x256xf32>
    %54 = vector.extract_strided_slice %53 {offsets = [0, 128], sizes = [64, 128], strides = [1, 1]} : vector<64x256xf32> to vector<64x128xf32>
    %55 = arith.addf %33, %54 : vector<64x128xf32>
    %56 = vector.extract_strided_slice %53 {offsets = [0, 0], sizes = [64, 128], strides = [1, 1]} : vector<64x256xf32> to vector<64x128xf32>
    %c0_38 = arith.constant 0 : index
    %c0_39 = arith.constant 0 : index
    %57 = vector.load %arg5[%c0_38, %c0_39] : memref<4x128xf32, #tpu.memory_space<vmem>>, vector<1x128xf32>
    %58 = vector.broadcast %57 : vector<1x128xf32> to vector<64x128xf32>
    %59 = arith.addf %56, %58 : vector<64x128xf32>
    %cst_40 = arith.constant 0.707106769 : f32
    %60 = vector.broadcast %cst_40 : f32 to vector<64x128xf32>
    %61 = arith.mulf %32, %60 : vector<64x128xf32>
    %62 = arith.addf %59, %61 : vector<64x128xf32>
    %63 = arith.truncf %62 : vector<64x128xf32> to vector<64x128xbf16>
    %c16_41 = arith.constant 16 : index
    %c0_42 = arith.constant 0 : index
    %64 = vector.load %arg11[%c16_41, %c0_42] : memref<96x128xbf16, #tpu.memory_space<vmem>>, vector<64x128xbf16>
    tpu.vector_store %arg11[%c16_41, %c0_42], %63 {strides = array<i32>} : memref<96x128xbf16, #tpu.memory_space<vmem>>, vector<64x128xbf16>,
    %c14 = arith.constant 14 : index
    %c0_43 = arith.constant 0 : index
    %65 = vector.load %arg11[%c14, %c0_43] : memref<96x128xbf16, #tpu.memory_space<vmem>>, vector<64x128xbf16>
    %c1_44 = arith.constant 1 : index
    %c0_45 = arith.constant 0 : index
    %c0_46 = arith.constant 0 : index
    %c0_47 = arith.constant 0 : index
    %66 = vector.load %arg4[%c1_44, %c0_45, %c0_46, %c0_47] : memref<4x3x128x128xbf16, #tpu.memory_space<vmem>>, vector<1x1x128x128xbf16>
    %67 = vector.shape_cast %66 : vector<1x1x128x128xbf16> to vector<128x128xbf16>
    %cst_48 = arith.constant dense<0.000000e+00> : vector<64x128xf32>
    %68 = tpu.matmul %65, %67, %cst_48 {dimension_numbers = #tpu.dot_dimension_numbers<[1], [0], [0], [1], [0, 0, 1, 1], [], []>} : vector<64x128xbf16>, vector<128x128xbf16>, vector<64x128xf32> -> vector<64x128xf32>
    %c16_49 = arith.constant 16 : index
    %c0_50 = arith.constant 0 : index
    %69 = vector.load %arg11[%c16_49, %c0_50] : memref<96x128xbf16, #tpu.memory_space<vmem>>, vector<64x128xbf16>
    %c1_51 = arith.constant 1 : index
    %c1_52 = arith.constant 1 : index
    %c0_53 = arith.constant 0 : index
    %c0_54 = arith.constant 0 : index
    %70 = vector.load %arg4[%c1_51, %c1_52, %c0_53, %c0_54] : memref<4x3x128x128xbf16, #tpu.memory_space<vmem>>, vector<1x1x128x128xbf16>
    %71 = vector.shape_cast %70 : vector<1x1x128x128xbf16> to vector<128x128xbf16>
    %cst_55 = arith.constant dense<0.000000e+00> : vector<64x128xf32>
    %72 = tpu.matmul %69, %71, %cst_55 {dimension_numbers = #tpu.dot_dimension_numbers<[1], [0], [0], [1], [0, 0, 1, 1], [], []>} : vector<64x128xbf16>, vector<128x128xbf16>, vector<64x128xf32> -> vector<64x128xf32>
    %73 = arith.addf %68, %72 : vector<64x128xf32>
    %c18 = arith.constant 18 : index
    %c0_56 = arith.constant 0 : index
    %74 = vector.load %arg11[%c18, %c0_56] : memref<96x128xbf16, #tpu.memory_space<vmem>>, vector<64x128xbf16>
    %c1_57 = arith.constant 1 : index
    %c2_58 = arith.constant 2 : index
    %c0_59 = arith.constant 0 : index
    %c0_60 = arith.constant 0 : index
    %75 = vector.load %arg4[%c1_57, %c2_58, %c0_59, %c0_60] : memref<4x3x128x128xbf16, #tpu.memory_space<vmem>>, vector<1x1x128x128xbf16>
    %76 = vector.shape_cast %75 : vector<1x1x128x128xbf16> to vector<128x128xbf16>
    %cst_61 = arith.constant dense<0.000000e+00> : vector<64x128xf32>
    %77 = tpu.matmul %74, %76, %cst_61 {dimension_numbers = #tpu.dot_dimension_numbers<[1], [0], [0], [1], [0, 0, 1, 1], [], []>} : vector<64x128xbf16>, vector<128x128xbf16>, vector<64x128xf32> -> vector<64x128xf32>
    %78 = arith.addf %73, %77 : vector<64x128xf32>
    %79 = arith.truncf %78 : vector<64x128xf32> to vector<64x128xbf16>
    %c1_62 = arith.constant 1 : index
    %c0_63 = arith.constant 0 : index
    %c0_64 = arith.constant 0 : index
    %80 = vector.load %arg6[%c1_62, %c0_63, %c0_64] : memref<4x128x256xbf16, #tpu.memory_space<vmem>>, vector<1x128x256xbf16>
    %81 = vector.shape_cast %80 : vector<1x128x256xbf16> to vector<128x256xbf16>
    %cst_65 = arith.constant dense<0.000000e+00> : vector<64x256xf32>
    %82 = tpu.matmul %79, %81, %cst_65 {dimension_numbers = #tpu.dot_dimension_numbers<[1], [0], [0], [1], [0, 0, 1, 1], [], []>} : vector<64x128xbf16>, vector<128x256xbf16>, vector<64x256xf32> -> vector<64x256xf32>
    %83 = vector.extract_strided_slice %82 {offsets = [0, 128], sizes = [64, 128], strides = [1, 1]} : vector<64x256xf32> to vector<64x128xf32>
    %84 = arith.addf %55, %83 : vector<64x128xf32>
    %85 = vector.extract_strided_slice %82 {offsets = [0, 0], sizes = [64, 128], strides = [1, 1]} : vector<64x256xf32> to vector<64x128xf32>
    %c1_66 = arith.constant 1 : index
    %c0_67 = arith.constant 0 : index
    %86 = vector.load %arg5[%c1_66, %c0_67] : memref<4x128xf32, #tpu.memory_space<vmem>>, vector<1x128xf32>
    %87 = vector.broadcast %86 : vector<1x128xf32> to vector<64x128xf32>
    %88 = arith.addf %85, %87 : vector<64x128xf32>
    %cst_68 = arith.constant 0.707106769 : f32
    %89 = vector.broadcast %cst_68 : f32 to vector<64x128xf32>
    %90 = arith.mulf %62, %89 : vector<64x128xf32>
    %91 = arith.addf %88, %90 : vector<64x128xf32>
    %92 = arith.truncf %91 : vector<64x128xf32> to vector<64x128xbf16>
    %c16_69 = arith.constant 16 : index
    %c0_70 = arith.constant 0 : index
    %93 = vector.load %arg11[%c16_69, %c0_70] : memref<96x128xbf16, #tpu.memory_space<vmem>>, vector<64x128xbf16>
    tpu.vector_store %arg11[%c16_69, %c0_70], %92 {strides = array<i32>} : memref<96x128xbf16, #tpu.memory_space<vmem>>, vector<64x128xbf16>,
    %c15_71 = arith.constant 15 : index
    %c0_72 = arith.constant 0 : index
    %94 = vector.load %arg11[%c15_71, %c0_72] : memref<96x128xbf16, #tpu.memory_space<vmem>>, vector<64x128xbf16>
    %c2_73 = arith.constant 2 : index
    %c0_74 = arith.constant 0 : index
    %c0_75 = arith.constant 0 : index
    %c0_76 = arith.constant 0 : index
    %95 = vector.load %arg4[%c2_73, %c0_74, %c0_75, %c0_76] : memref<4x3x128x128xbf16, #tpu.memory_space<vmem>>, vector<1x1x128x128xbf16>
    %96 = vector.shape_cast %95 : vector<1x1x128x128xbf16> to vector<128x128xbf16>
    %cst_77 = arith.constant dense<0.000000e+00> : vector<64x128xf32>
    %97 = tpu.matmul %94, %96, %cst_77 {dimension_numbers = #tpu.dot_dimension_numbers<[1], [0], [0], [1], [0, 0, 1, 1], [], []>} : vector<64x128xbf16>, vector<128x128xbf16>, vector<64x128xf32> -> vector<64x128xf32>
    %c16_78 = arith.constant 16 : index
    %c0_79 = arith.constant 0 : index
    %98 = vector.load %arg11[%c16_78, %c0_79] : memref<96x128xbf16, #tpu.memory_space<vmem>>, vector<64x128xbf16>
    %c2_80 = arith.constant 2 : index
    %c1_81 = arith.constant 1 : index
    %c0_82 = arith.constant 0 : index
    %c0_83 = arith.constant 0 : index
    %99 = vector.load %arg4[%c2_80, %c1_81, %c0_82, %c0_83] : memref<4x3x128x128xbf16, #tpu.memory_space<vmem>>, vector<1x1x128x128xbf16>
    %100 = vector.shape_cast %99 : vector<1x1x128x128xbf16> to vector<128x128xbf16>
    %cst_84 = arith.constant dense<0.000000e+00> : vector<64x128xf32>
    %101 = tpu.matmul %98, %100, %cst_84 {dimension_numbers = #tpu.dot_dimension_numbers<[1], [0], [0], [1], [0, 0, 1, 1], [], []>} : vector<64x128xbf16>, vector<128x128xbf16>, vector<64x128xf32> -> vector<64x128xf32>
    %102 = arith.addf %97, %101 : vector<64x128xf32>
    %c17_85 = arith.constant 17 : index
    %c0_86 = arith.constant 0 : index
    %103 = vector.load %arg11[%c17_85, %c0_86] : memref<96x128xbf16, #tpu.memory_space<vmem>>, vector<64x128xbf16>
    %c2_87 = arith.constant 2 : index
    %c2_88 = arith.constant 2 : index
    %c0_89 = arith.constant 0 : index
    %c0_90 = arith.constant 0 : index
    %104 = vector.load %arg4[%c2_87, %c2_88, %c0_89, %c0_90] : memref<4x3x128x128xbf16, #tpu.memory_space<vmem>>, vector<1x1x128x128xbf16>
    %105 = vector.shape_cast %104 : vector<1x1x128x128xbf16> to vector<128x128xbf16>
    %cst_91 = arith.constant dense<0.000000e+00> : vector<64x128xf32>
    %106 = tpu.matmul %103, %105, %cst_91 {dimension_numbers = #tpu.dot_dimension_numbers<[1], [0], [0], [1], [0, 0, 1, 1], [], []>} : vector<64x128xbf16>, vector<128x128xbf16>, vector<64x128xf32> -> vector<64x128xf32>
    %107 = arith.addf %102, %106 : vector<64x128xf32>
    %108 = arith.truncf %107 : vector<64x128xf32> to vector<64x128xbf16>
    %c2_92 = arith.constant 2 : index
    %c0_93 = arith.constant 0 : index
    %c0_94 = arith.constant 0 : index
    %109 = vector.load %arg6[%c2_92, %c0_93, %c0_94] : memref<4x128x256xbf16, #tpu.memory_space<vmem>>, vector<1x128x256xbf16>
    %110 = vector.shape_cast %109 : vector<1x128x256xbf16> to vector<128x256xbf16>
    %cst_95 = arith.constant dense<0.000000e+00> : vector<64x256xf32>
    %111 = tpu.matmul %108, %110, %cst_95 {dimension_numbers = #tpu.dot_dimension_numbers<[1], [0], [0], [1], [0, 0, 1, 1], [], []>} : vector<64x128xbf16>, vector<128x256xbf16>, vector<64x256xf32> -> vector<64x256xf32>
    %112 = vector.extract_strided_slice %111 {offsets = [0, 128], sizes = [64, 128], strides = [1, 1]} : vector<64x256xf32> to vector<64x128xf32>
    %113 = arith.addf %84, %112 : vector<64x128xf32>
    %114 = vector.extract_strided_slice %111 {offsets = [0, 0], sizes = [64, 128], strides = [1, 1]} : vector<64x256xf32> to vector<64x128xf32>
    %c2_96 = arith.constant 2 : index
    %c0_97 = arith.constant 0 : index
    %115 = vector.load %arg5[%c2_96, %c0_97] : memref<4x128xf32, #tpu.memory_space<vmem>>, vector<1x128xf32>
    %116 = vector.broadcast %115 : vector<1x128xf32> to vector<64x128xf32>
    %117 = arith.addf %114, %116 : vector<64x128xf32>
    %cst_98 = arith.constant 0.707106769 : f32
    %118 = vector.broadcast %cst_98 : f32 to vector<64x128xf32>
    %119 = arith.mulf %91, %118 : vector<64x128xf32>
    %120 = arith.addf %117, %119 : vector<64x128xf32>
    %121 = arith.truncf %120 : vector<64x128xf32> to vector<64x128xbf16>
    %c16_99 = arith.constant 16 : index
    %c0_100 = arith.constant 0 : index
    %122 = vector.load %arg11[%c16_99, %c0_100] : memref<96x128xbf16, #tpu.memory_space<vmem>>, vector<64x128xbf16>
    tpu.vector_store %arg11[%c16_99, %c0_100], %121 {strides = array<i32>} : memref<96x128xbf16, #tpu.memory_space<vmem>>, vector<64x128xbf16>,
    %c14_101 = arith.constant 14 : index
    %c0_102 = arith.constant 0 : index
    %123 = vector.load %arg11[%c14_101, %c0_102] : memref<96x128xbf16, #tpu.memory_space<vmem>>, vector<64x128xbf16>
    %c3_103 = arith.constant 3 : index
    %c0_104 = arith.constant 0 : index
    %c0_105 = arith.constant 0 : index
    %c0_106 = arith.constant 0 : index
    %124 = vector.load %arg4[%c3_103, %c0_104, %c0_105, %c0_106] : memref<4x3x128x128xbf16, #tpu.memory_space<vmem>>, vector<1x1x128x128xbf16>
    %125 = vector.shape_cast %124 : vector<1x1x128x128xbf16> to vector<128x128xbf16>
    %cst_107 = arith.constant dense<0.000000e+00> : vector<64x128xf32>
    %126 = tpu.matmul %123, %125, %cst_107 {dimension_numbers = #tpu.dot_dimension_numbers<[1], [0], [0], [1], [0, 0, 1, 1], [], []>} : vector<64x128xbf16>, vector<128x128xbf16>, vector<64x128xf32> -> vector<64x128xf32>
    %c16_108 = arith.constant 16 : index
    %c0_109 = arith.constant 0 : index
    %127 = vector.load %arg11[%c16_108, %c0_109] : memref<96x128xbf16, #tpu.memory_space<vmem>>, vector<64x128xbf16>
    %c3_110 = arith.constant 3 : index
    %c1_111 = arith.constant 1 : index
    %c0_112 = arith.constant 0 : index
    %c0_113 = arith.constant 0 : index
    %128 = vector.load %arg4[%c3_110, %c1_111, %c0_112, %c0_113] : memref<4x3x128x128xbf16, #tpu.memory_space<vmem>>, vector<1x1x128x128xbf16>
    %129 = vector.shape_cast %128 : vector<1x1x128x128xbf16> to vector<128x128xbf16>
    %cst_114 = arith.constant dense<0.000000e+00> : vector<64x128xf32>
    %130 = tpu.matmul %127, %129, %cst_114 {dimension_numbers = #tpu.dot_dimension_numbers<[1], [0], [0], [1], [0, 0, 1, 1], [], []>} : vector<64x128xbf16>, vector<128x128xbf16>, vector<64x128xf32> -> vector<64x128xf32>
    %131 = arith.addf %126, %130 : vector<64x128xf32>
    %c18_115 = arith.constant 18 : index
    %c0_116 = arith.constant 0 : index
    %132 = vector.load %arg11[%c18_115, %c0_116] : memref<96x128xbf16, #tpu.memory_space<vmem>>, vector<64x128xbf16>
    %c3_117 = arith.constant 3 : index
    %c2_118 = arith.constant 2 : index
    %c0_119 = arith.constant 0 : index
    %c0_120 = arith.constant 0 : index
    %133 = vector.load %arg4[%c3_117, %c2_118, %c0_119, %c0_120] : memref<4x3x128x128xbf16, #tpu.memory_space<vmem>>, vector<1x1x128x128xbf16>
    %134 = vector.shape_cast %133 : vector<1x1x128x128xbf16> to vector<128x128xbf16>
    %cst_121 = arith.constant dense<0.000000e+00> : vector<64x128xf32>
    %135 = tpu.matmul %132, %134, %cst_121 {dimension_numbers = #tpu.dot_dimension_numbers<[1], [0], [0], [1], [0, 0, 1, 1], [], []>} : vector<64x128xbf16>, vector<128x128xbf16>, vector<64x128xf32> -> vector<64x128xf32>
    %136 = arith.addf %131, %135 : vector<64x128xf32>
    %137 = arith.truncf %136 : vector<64x128xf32> to vector<64x128xbf16>
    %c3_122 = arith.constant 3 : index
    %c0_123 = arith.constant 0 : index
    %c0_124 = arith.constant 0 : index
    %138 = vector.load %arg6[%c3_122, %c0_123, %c0_124] : memref<4x128x256xbf16, #tpu.memory_space<vmem>>, vector<1x128x256xbf16>
    %139 = vector.shape_cast %138 : vector<1x128x256xbf16> to vector<128x256xbf16>
    %cst_125 = arith.constant dense<0.000000e+00> : vector<64x256xf32>
    %140 = tpu.matmul %137, %139, %cst_125 {dimension_numbers = #tpu.dot_dimension_numbers<[1], [0], [0], [1], [0, 0, 1, 1], [], []>} : vector<64x128xbf16>, vector<128x256xbf16>, vector<64x256xf32> -> vector<64x256xf32>
    %141 = vector.extract_strided_slice %140 {offsets = [0, 128], sizes = [64, 128], strides = [1, 1]} : vector<64x256xf32> to vector<64x128xf32>
    %142 = arith.addf %113, %141 : vector<64x128xf32>
    %c1_126 = arith.constant 1 : index
    %c0_127 = arith.constant 0 : index
    %143 = vector.load %arg3[%c1_126, %c0_127] : memref<4x128xf32, #tpu.memory_space<vmem>>, vector<1x128xf32>
    %144 = vector.broadcast %143 : vector<1x128xf32> to vector<64x128xf32>
    %145 = arith.addf %142, %144 : vector<64x128xf32>
    %cst_128 = arith.constant 0.000000e+00 : f32
    %146 = vector.broadcast %cst_128 : f32 to vector<64x128xf32>
    %147 = arith.cmpf oge, %145, %146 : vector<64x128xf32>
    %cst_129 = arith.constant 2.000000e-01 : f32
    %148 = vector.broadcast %cst_129 : f32 to vector<64x128xf32>
    %149 = arith.mulf %148, %145 : vector<64x128xf32>
    %150 = arith.select %147, %145, %149 : vector<64x128xi1>, vector<64x128xf32>
    %151 = arith.truncf %150 : vector<64x128xf32> to vector<64x128xbf16>
    %c0_130 = arith.constant 0 : index
    %c0_131 = arith.constant 0 : index
    %152 = vector.load %arg7[%c0_130, %c0_131] : memref<128x128xbf16, #tpu.memory_space<vmem>>, vector<128x128xbf16>
    %cst_132 = arith.constant dense<0.000000e+00> : vector<64x128xf32>
    %153 = tpu.matmul %151, %152, %cst_132 {dimension_numbers = #tpu.dot_dimension_numbers<[1], [0], [0], [1], [0, 0, 1, 1], [], []>} : vector<64x128xbf16>, vector<128x128xbf16>, vector<64x128xf32> -> vector<64x128xf32>
    %c2_133 = arith.constant 2 : index
    %c0_134 = arith.constant 0 : index
    %154 = vector.load %arg3[%c2_133, %c0_134] : memref<4x128xf32, #tpu.memory_space<vmem>>, vector<1x128xf32>
    %155 = vector.broadcast %154 : vector<1x128xf32> to vector<64x128xf32>
    %156 = arith.addf %153, %155 : vector<64x128xf32>
    %cst_135 = arith.constant 0.000000e+00 : f32
    %157 = vector.broadcast %cst_135 : f32 to vector<64x128xf32>
    %158 = arith.cmpf oge, %156, %157 : vector<64x128xf32>
    %cst_136 = arith.constant 2.000000e-01 : f32
    %159 = vector.broadcast %cst_136 : f32 to vector<64x128xf32>
    %160 = arith.mulf %159, %156 : vector<64x128xf32>
    %161 = arith.select %158, %156, %160 : vector<64x128xi1>, vector<64x128xf32>
    %162 = arith.truncf %161 : vector<64x128xf32> to vector<64x128xbf16>
    %c0_137 = arith.constant 0 : index
    %c0_138 = arith.constant 0 : index
    %163 = vector.load %arg8[%c0_137, %c0_138] : memref<128x128xbf16, #tpu.memory_space<vmem>>, vector<128x128xbf16>
    %cst_139 = arith.constant dense<0.000000e+00> : vector<64x128xf32>
    %164 = tpu.matmul %162, %163, %cst_139 {dimension_numbers = #tpu.dot_dimension_numbers<[1], [0], [0], [1], [0, 0, 1, 1], [], []>} : vector<64x128xbf16>, vector<128x128xbf16>, vector<64x128xf32> -> vector<64x128xf32>
    %c0_140 = arith.constant 0 : index
    %c0_141 = arith.constant 0 : index
    %165 = vector.load %arg9[%c0_140, %c0_141] : memref<1x128xf32, #tpu.memory_space<vmem>>, vector<1x128xf32>
    %166 = vector.broadcast %165 : vector<1x128xf32> to vector<64x128xf32>
    %167 = arith.addf %164, %166 : vector<64x128xf32>
    %168 = vector.extract_strided_slice %167 {offsets = [0, 0], sizes = [64, 4], strides = [1, 1]} : vector<64x128xf32> to vector<64x4xf32>
    %c0_142 = arith.constant 0 : index
    %c0_143 = arith.constant 0 : index
    %c0_144 = arith.constant 0 : index
    %169 = vector.load %arg10[%c0_142, %c0_143, %c0_144] : memref<1x64x4xf32, #tpu.memory_space<vmem>>, vector<1x64x4xf32>
    %170 = vector.shape_cast %169 : vector<1x64x4xf32> to vector<64x4xf32>
    %171 = vector.shape_cast %168 : vector<64x4xf32> to vector<1x64x4xf32>
    tpu.vector_store %arg10[%c0_142, %c0_143, %c0_144], %171 {strides = array<i32>} : memref<1x64x4xf32, #tpu.memory_space<vmem>>, vector<1x64x4xf32>,
    return
  }
  func.func @transform_0(%arg0: i32) -> (i32, i32, i32) {
    %c0_i32 = arith.constant 0 : i32
    %c0_i32_0 = arith.constant 0 : i32
    %c0_i32_1 = arith.constant 0 : i32
    return %arg0, %c0_i32, %c0_i32_0 : i32, i32, i32
  }
  func.func @transform_1(%arg0: i32) -> (i32, i32) {
    %c0_i32 = arith.constant 0 : i32
    %c0_i32_0 = arith.constant 0 : i32
    %c0_i32_1 = arith.constant 0 : i32
    return %c0_i32, %c0_i32_0 : i32, i32
  }
  func.func @transform_2(%arg0: i32) -> (i32, i32) {
    %c0_i32 = arith.constant 0 : i32
    %c0_i32_0 = arith.constant 0 : i32
    %c0_i32_1 = arith.constant 0 : i32
    return %c0_i32, %c0_i32_0 : i32, i32
  }
  func.func @transform_3(%arg0: i32) -> (i32, i32, i32, i32) {
    %c0_i32 = arith.constant 0 : i32
    %c0_i32_0 = arith.constant 0 : i32
    %c0_i32_1 = arith.constant 0 : i32
    %c0_i32_2 = arith.constant 0 : i32
    %c0_i32_3 = arith.constant 0 : i32
    return %c0_i32, %c0_i32_0, %c0_i32_1, %c0_i32_2 : i32, i32, i32, i32
  }
  func.func @transform_4(%arg0: i32) -> (i32, i32) {
    %c0_i32 = arith.constant 0 : i32
    %c0_i32_0 = arith.constant 0 : i32
    %c0_i32_1 = arith.constant 0 : i32
    return %c0_i32, %c0_i32_0 : i32, i32
  }
  func.func @transform_5(%arg0: i32) -> (i32, i32, i32) {
    %c0_i32 = arith.constant 0 : i32
    %c0_i32_0 = arith.constant 0 : i32
    %c0_i32_1 = arith.constant 0 : i32
    %c0_i32_2 = arith.constant 0 : i32
    return %c0_i32, %c0_i32_0, %c0_i32_1 : i32, i32, i32
  }
  func.func @transform_6(%arg0: i32) -> (i32, i32) {
    %c0_i32 = arith.constant 0 : i32
    %c0_i32_0 = arith.constant 0 : i32
    %c0_i32_1 = arith.constant 0 : i32
    return %c0_i32, %c0_i32_0 : i32, i32
  }
  func.func @transform_7(%arg0: i32) -> (i32, i32) {
    %c0_i32 = arith.constant 0 : i32
    %c0_i32_0 = arith.constant 0 : i32
    %c0_i32_1 = arith.constant 0 : i32
    return %c0_i32, %c0_i32_0 : i32, i32
  }
  func.func @transform_8(%arg0: i32) -> (i32, i32) {
    %c0_i32 = arith.constant 0 : i32
    %c0_i32_0 = arith.constant 0 : i32
    %c0_i32_1 = arith.constant 0 : i32
    return %c0_i32, %c0_i32_0 : i32, i32
  }
  func.func @transform_9(%arg0: i32) -> (i32, i32, i32) {
    %c0_i32 = arith.constant 0 : i32
    %c0_i32_0 = arith.constant 0 : i32
    %c0_i32_1 = arith.constant 0 : i32
    return %arg0, %c0_i32, %c0_i32_0 : i32, i32, i32
  }
}

</mosaic_0001>

<bundles_post_ra>
// kernel: wavenet_discriminator_forward.1
= control target key start
LH: loop header
LB: loop body
LE: loop exit
PB: predicated region body
PF: predicated region fallthrough
CT: control target
= control target key end

     0   :  { %14 = vsyncpa [#allocation4], 0  ;;  %s5467_s0 = inlined_call_operand.vmem [shape: f32[2,64,4], index: 0, kind: input, shape index: {}]   ;;  %s5468_s1 = inlined_call_operand.vmem [shape: f32[4,128], index: 1, kind: input, shape index: {}]   ;;  %s5469_s2 = inlined_call_operand.vmem [shape: f32[4,128], index: 2, kind: input, shape index: {}]   ;;  %s5470_s3 = inlined_call_operand.hbm [shape: bf16[4,3,128,128], index: 3, kind: input, shape index: {}]   ;;  %s5471_s4 = inlined_call_operand.vmem [shape: f32[4,128], index: 4, kind: input, shape index: {}]   ;;  %s5472_s5 = inlined_call_operand.hbm [shape: bf16[4,128,256], index: 5, kind: input, shape index: {}]   ;;  %s5473_s6 = inlined_call_operand.vmem [shape: bf16[128,128], index: 6, kind: input, shape index: {}]   ;;  %s5474_s7 = inlined_call_operand.vmem [shape: bf16[128,128], index: 7, kind: input, shape index: {}]   ;;  %s5475_s8 = inlined_call_operand.vmem [shape: f32[1,128], index: 8, kind: input, shape index: {}]   ;;  %s5476_s9 = inlined_call_operand.vmem [shape: f32[2,64,4], index: 9, kind: output, shape index: {}]  }
   0x1   :  { %15 = vsyncpa [#allocation6], 0  ;;  %s4897_s30 = smov 0  }
   0x2 LB: > { %s4837_s10 = smov [#allocation3]   ;;  %s4903_s12 = sadd.s32 4294967295, %s4835_s30   ;;  %s4835_s30 = sphi %s4897_s30, %s21_s30  }
   0x3   : > { %s264_s11 = sshll.u32 %s4837_s10, 4  ;;  %p3734_p0 = scmp.ge.s32.totalorder %s4835_s30, 1  ;;  %s265_s11 = int_to_ptr.vmem [resolvable:$true] %s264_s11 }
   0x4   : > { %p246_p1 = scmp.lt.s32.totalorder %s4835_s30, 3  ;;  %p5477_p3 = scmp.eq.s32.totalorder %s4903_s12, 0 }
   0x5   : > { %s4838_s14 = smov [#allocation5]   ;;  %s4765_s19 = scalar_lea.hbm %s5470_s3, 12288 }
   0x6   : > { %p4907_p2 = pnand %p3734_p0, %p246_p1  ;;  %s280_s15 = sshll.u32 %s4838_s14, 4  ;;  %s4920_s15 = int_to_ptr.vmem [resolvable:$true] %s280_s15 }
   0x7   : > { %p4766_p6 = scmp.ne.s32.totalorder %s5470_s3, %s4765_s19  ;;  %p4772_p10 = scmp.lt.u32.totalorder %s4765_s19, %s5470_s3 }
   0x8   : > { %s5479_s13 = scalar_select %p4907_p2, 1, 0 }
   0x9   : > { %p4512_p4 = pneg %p4907_p2 }
   0xb   : > { %p4916_p5 = pnand %p5477_p3, %p4512_p4 }
   0xd   : > { %p4767_p7 = pneg %p4916_p5 }
   0xf   : > { %p4768_p8 = pnand %p4767_p7, %p4766_p6 }
  0x11   : > { %p4769_p9 = pneg %p4768_p8 }
  0x13   : > { %p4774_p11 = pnand %p4772_p10, %p4769_p9 }
  0x15   : > { %4777 = shalt.err (!%p4774_p11)
}
  0x16   : > { %s4778_s24 = scalar_lea.vmem %s265_s11, 12288  ;;  %p4786_p1 = scmp.lt.s32.totalorder %s265_s11, %s265_s11 }
  0x17   : > { %p4779_p12 = scmp.ne.s32.totalorder %s265_s11, %s4778_s24  ;;  %p4787_p4 = scmp.lt.s32.totalorder %s4778_s24, %s4778_s24 }
  0x19   : > { %p4781_p13 = pnand %p4779_p12, %p4767_p7  ;;  %p4788_p3 = por %p4787_p4, %p4786_p1 }
  0x1b   : > { %p4782_p0 = pneg %p4781_p13 }
  0x1d   : > { %p4789_p2 = pnand %p4788_p3, %p4782_p0 }
  0x1f   : > { %4792 = shalt.err (!%p4789_p2)
}
  0x20   : > { %s4839_s25 = smov 64   ;;  %s4840_s26 = smov 4  }
  0x21   : > { %4515 = dma.hbm_to_vmem [thread:$0]  (!%p4916_p5), %s5470_s3, 12288, %s265_s11, [#allocation4], %s4839_s25, %s4839_s25, %s4840_s26  }
  0x22   : > { %s4793_s14 = scalar_lea.hbm %s5472_s5, 8192 }
  0x23   : > { %p4794_p6 = scmp.ne.s32.totalorder %s5472_s5, %s4793_s14  ;;  %p4800_p8 = scmp.lt.u32.totalorder %s4793_s14, %s5472_s5 }
  0x25   : > { %p4796_p2 = pnand %p4794_p6, %p4767_p7 }
  0x27   : > { %p4797_p3 = pneg %p4796_p2 }
  0x29   : > { %p4802_p9 = pnand %p4800_p8, %p4797_p3 }
  0x2b   : > { %4805 = shalt.err (!%p4802_p9)
}
  0x2c   : > { %s4806_s11 = scalar_lea.vmem %s4920_s15, 8192  ;;  %p4814_p13 = scmp.lt.s32.totalorder %s4920_s15, %s4920_s15 }
  0x2d   : > { %p4807_p10 = scmp.ne.s32.totalorder %s4920_s15, %s4806_s11  ;;  %p4815_p0 = scmp.lt.s32.totalorder %s4806_s11, %s4806_s11 }
  0x2f   : > { %p4809_p11 = pnand %p4807_p10, %p4767_p7  ;;  %p4816_p1 = por %p4815_p0, %p4814_p13 }
  0x31   : > { %p4810_p12 = pneg %p4809_p11 }
  0x33   : > { %p4817_p4 = pnand %p4816_p1, %p4810_p12 }
  0x35   : > { %4820 = shalt.err (!%p4817_p4)
}
  0x36   : > { %s4841_s21 = smov 128   ;;  %s4842_s22 = smov 8  }
  0x37   : > { %4518 = dma.hbm_to_vmem [thread:$0]  (!%p4916_p5), %s5472_s5, 8192, %s4920_s15, [#allocation6], %s4841_s21, %s4841_s21, %s4842_s22  }
  0x38   : > { %p5481_p6 = scmp.ne.s32.totalorder %s5479_s13, 0 }
  0x39   : > { %p5482_p7 = scmp.eq.s32.totalorder (!%p5481_p6), %s4903_s12, 0 }
  0x3a   : > { %313 = sbr.rel (%p5481_p6) target bundleno = 2762 (0xaca), region = 56 }
  0x41   : > { %4826 = dma.done.wait (%p5482_p7), [#allocation4], 12288   ;;  %p5483_p2 = pmov %p5482_p7 }
  0x43   : > { %4828 = vsyncadd (%p5483_p2), [#allocation4], 4294955008  ;;  %p5484_p3 = pmov %p5483_p2 }
  0x44   : > { %p5485_p8 = pmov %p5483_p2 }
  0x45   : > { %4830 = dma.done.wait (%p5484_p3), [#allocation6], 8192  }
  0x46   : > { %4832 = vsyncadd (%p5485_p8), [#allocation6], 4294959104  ;;  %p353_p9 = scmp.lt.s32.totalorder %s4903_s12, 1  ;;  %v4843_v0 = vmov 2   ;;  %v4844_v1 = vmov 0   ;;  %v4845_v6 = vmov 3  }
  0x47   : > { %4544 = vset.pattern.permute.xlu0 %v4843_v0  ;;  %4541 = vset.pattern.permute.xlu1 %v4844_v1  ;;  %364 = vst [vmem:[#allocation2] sm:$0xff] %v4844_v1  ;;  %365 = vst [vmem:[#allocation2 + $0x28] sm:$0xff] %v4844_v1  ;;  %v4555_v7 = vld [vmem:[#allocation3 + $0x40] sm:$0xff]   ;;  %v4846_v8 = vmov 1   ;;  %v4556_v9 = vld [vmem:[#allocation3 + $0x48] sm:$0xff]   ;;  %vm1473_vm2 = vcmask 1040384  }
  0x48   : > { %s5487_s12 = smov (!%p353_p9, %s4903_s12), 1  ;;  %1229 = vmatprep.mubr.bf16.mxu1 %v4844_v1  ;;  %4104 = vmatprep.subr.bf16.mxu0 %v4555_v7  ;;  %v4557_v10 = vld [vmem:[#allocation3 + $0x50] sm:$0xff]   ;;  %v4558_v12 = vld [vmem:[#allocation3 + $0x58] sm:$0xff]   ;;  %v4559_v13 = vld [vmem:[#allocation3 + $0x60] sm:$0xff]   ;;  %vm759_vm0 = vsmask.f32 256 }
  0x49   : > { %s3934_s13 = sshll.u32 %s5487_s12, 6  ;;  %4105 = vmatpush3.bf16.msra.mxu0 %v4555_v7  ;;  %v4560_v14 = vld [vmem:[#allocation3 + $0x68] sm:$0xff]   ;;  %v4561_v15 = vld [vmem:[#allocation3 + $0x70] sm:$0xff]   ;;  %v4562_v18 = vld [vmem:[#allocation3 + $0x78] sm:$0xff]   ;;  %vm935_vm1 = vsmask.f32 7424 }
  0x4a   : > { %s4994_s25 = scalar_lea.vmem %s5467_s0, %s3934_s13  ;;  %4106 = vmatprep.subr.bf16.mxu0 %v4556_v9  ;;  %v5011_v20 = vld [vmem:[#allocation3] sm:$0xff]   ;;  %v4582_v27 = vld [vmem:[#allocation5 + $0x14] ss:$8 sps:$4 sm:$0xff]   ;;  %v4584_v30 = vld [vmem:[#allocation5 + $0x10] ss:$8 sps:$4 sm:$0xff]   ;;  %vm1627_vm3 = vcmask 1046528   ;;  %s362_s28 = scalar_lea.vmem %s5476_s9, %s3934_s13 }
  0x4b   : > { %v368_v2 = vld [vmem:[%s4994_s25 + $0x10] sm:$0xff]  ;;  %v367_v3 = vld [vmem:[%s4994_s25 + $0x8] sm:$0xff]  ;;  %v369_v4 = vld [vmem:[%s4994_s25 + $0x18] sm:$0xff] }
  0x4c   : > { %393 = vperm.xlu1 %4541, %v368_v2   ;;  %500 = vperm.xlu0 %4544, %v367_v3   ;;  %v366_v5 = vld [vmem:[%s4994_s25] sm:$0xff]  ;;  %v371_v11 = vld [vmem:[%s4994_s25 + $0x28] sm:$0xff]  ;;  %v373_v17 = vld [vmem:[%s4994_s25 + $0x38] sm:$0xff] }
  0x4d   : > { %4107 = vmatpush3.bf16.msra.mxu0 %v4556_v9  ;;  %v370_v16 = vld [vmem:[%s4994_s25 + $0x20] sm:$0xff]  ;;  %v372_v19 = vld [vmem:[%s4994_s25 + $0x30] sm:$0xff] }
  0x4e   : > { %4108 = vmatprep.subr.bf16.mxu0 %v4557_v10  ;;  %v4579_v25 = vld [vmem:[#allocation5 + $0x4] ss:$8 sps:$4 sm:$0xff]   ;;  %v4581_v26 = vld [vmem:[#allocation5] ss:$8 sps:$4 sm:$0xff]   ;;  %v4588_v35 = vld [vmem:[#allocation5 + $0x34] ss:$8 sps:$4 sm:$0xff]  }
  0x4f   : > { %1197 = vmatprep.subr.bf16.mxu1 %v4579_v25  ;;  %v4585_v31 = vld [vmem:[#allocation5 + $0x24] ss:$8 sps:$4 sm:$0xff]   ;;  %v4587_v33 = vld [vmem:[#allocation5 + $0x20] ss:$8 sps:$4 sm:$0xff]   ;;  %v4590_v36 = vld [vmem:[#allocation5 + $0x30] ss:$8 sps:$4 sm:$0xff]  }
  0x50   : > { %398 = vperm.xlu1 %4541, %v369_v4   ;;  %4545 = vset.pattern.permute.xlu0 %v4845_v6  ;;  %v4591_v39 = vld [vmem:[#allocation5 + $0x44] ss:$8 sps:$4 sm:$0xff]   ;;  %v5021_v40 = vld [vmem:[%s5468_s1] ss:$0 sm:$0xff]  ;;  %v4593_v42 = vld [vmem:[#allocation5 + $0x40] ss:$8 sps:$4 sm:$0xff]  }
  0x51   : > { %549 = vperm.xlu0 %4545, %v366_v5   ;;  %4109 = vmatpush3.bf16.msra.mxu0 %v4557_v10  ;;  %v4594_v46 = vld [vmem:[#allocation5 + $0x54] ss:$8 sps:$4 sm:$0xff]   ;;  %v5030_v47 = vld [vmem:[%s5469_s2] ss:$0 sm:$0xff]  ;;  %v5035_v48 = vld [vmem:[%s5468_s1 + $0x1] ss:$0 sm:$0xff] }
  0x52   : > { %4110 = vmatprep.subr.bf16.mxu0 %v4558_v12  ;;  %1198 = vmatpush1.bf16.msra.mxu1 %v4581_v26  ;;  %v4596_v50 = vld [vmem:[#allocation5 + $0x50] ss:$8 sps:$4 sm:$0xff]   ;;  %v4597_v54 = vld [vmem:[#allocation5 + $0x64] ss:$8 sps:$4 sm:$0xff]   ;;  %v4599_v63 = vld [vmem:[#allocation5 + $0x60] ss:$8 sps:$4 sm:$0xff]  }
  0x53   : > { %1199 = vmatprep.subr.bf16.mxu1 %v4582_v27  ;;  %v5044_v56 = vld [vmem:[%s5468_s1 + $0x2] ss:$0 sm:$0xff]  ;;  %v5050_v59 = vld [vmem:[%s5468_s1 + $0x3] ss:$0 sm:$0xff] }
  0x54   : > { %4542 = vset.pattern.permute.xlu1 %v4846_v8 }
  0x55   : > { %447 = vperm.xlu1 %4542, %v367_v3   ;;  %561 = vperm.xlu0 %4545, %v369_v4  }
  0x56   : > { %4111 = vmatpush3.bf16.msra.mxu0 %v4558_v12  ;;  %1200 = vmatpush1.bf16.msra.mxu1 %v4584_v30 }
  0x57   : > { %4112 = vmatprep.subr.bf16.mxu0 %v4559_v13  ;;  %1201 = vmatprep.subr.bf16.mxu1 %v4585_v31  ;;  %v4565_v31 = vld [vmem:[#allocation3 + $0x10] sm:$0xff]  }
  0x59   : > { %451 = vperm.xlu1 %4542, %v368_v2   ;;  %4547 = vset.pattern.permute.xlu0 %v4844_v1 }
  0x5a   : > { %383 = vperm.xlu0 %4547, %v366_v5   ;;  %4113 = vmatpush3.bf16.msra.mxu0 %v4559_v13 }
  0x5b   : > { %4114 = vmatprep.subr.bf16.mxu0 %v4560_v14  ;;  %1202 = vmatpush1.bf16.msra.mxu1 %v4587_v33  ;;  %v4566_v33 = vld [vmem:[#allocation3 + $0x18] sm:$0xff]  }
  0x5c   : > { %1203 = vmatprep.subr.bf16.mxu1 %v4588_v35 }
  0x5d   : > { %4543 = vset.pattern.permute.xlu1 %v4843_v0 }
  0x5e   : > { %388 = vperm.xlu0 %4547, %v367_v3   ;;  %496 = vperm.xlu1 %4543, %v366_v5  }
  0x5f   : > { %4115 = vmatpush3.bf16.msra.mxu0 %v4560_v14  ;;  %1204 = vmatpush1.bf16.msra.mxu1 %v4590_v36 }
  0x60   : > { %4116 = vmatprep.subr.bf16.mxu0 %v4561_v15  ;;  %1205 = vmatprep.subr.bf16.mxu1 %v4591_v39  ;;  %v4569_v39 = vld [vmem:[#allocation3 + $0x30] sm:$0xff]  }
  0x62   : > { %408 = vperm.xlu0 %4547, %v371_v11   ;;  %504 = vperm.xlu1 %4543, %v368_v2  }
  0x63   : > { %4117 = vmatpush3.bf16.msra.mxu0 %v4561_v15  ;;  %1206 = vmatpush1.bf16.msra.mxu1 %v4593_v42 }
  0x64   : > { %4118 = vmatprep.subr.bf16.mxu0 %v4562_v18  ;;  %1207 = vmatprep.subr.bf16.mxu1 %v4594_v46 }
  0x66   : > { %4549 = vset.pattern.permute.xlu0 %v4846_v8  ;;  %508 = vperm.xlu1 %4543, %v369_v4  }
  0x67   : > { %443 = vperm.xlu0 %4549, %v366_v5   ;;  %4119 = vmatpush3.bf16.msra.mxu0 %v4562_v18 }
  0x68   : > { %4128 = vmatprep.subr.bf16.mxu0 %v5011_v20  ;;  %1208 = vmatpush1.bf16.msra.mxu1 %v4596_v50 }
  0x69   : > { %1209 = vmatprep.subr.bf16.mxu1 %v4597_v54  ;;  %v5092_v54 = vld [vmem:[#allocation3 + $0x80] sm:$0xff]  }
  0x6a   : > { %4546 = vset.pattern.permute.xlu1 %v4845_v6 }
  0x6b   : > { %455 = vperm.xlu0 %4549, %v369_v4   ;;  %553 = vperm.xlu1 %4546, %v367_v3  }
  0x6c   : > { %1210 = vmatpush1.bf16.msra.mxu1 %v4599_v63 }
  0x6f   : > { %557 = vperm.xlu1 %4546, %v368_v2   ;;  %459 = vperm.xlu0 %4549, %v370_v16  }
  0x73   : > { %4548 = vset.pattern.permute.xlu1 %v4844_v1  ;;  %471 = vperm.xlu0 %4549, %v373_v17  }
  0x74   : > { %403 = vperm.xlu1 %4548, %v370_v16  }
  0x77   : > { %4552 = vset.pattern.permute.xlu0 %v4843_v0 }
  0x78   : > { %413 = vperm.xlu1 %4548, %v372_v19   ;;  %516 = vperm.xlu0 %4552, %v371_v11  }
  0x7c   : > { %418 = vperm.xlu1 %4548, %v373_v17   ;;  %4553 = vset.pattern.permute.xlu0 %v4845_v6 }
  0x7d   : > { %565 = vperm.xlu0 %4553, %v370_v16  }
  0x80   : > { %4550 = vset.pattern.permute.xlu1 %v4846_v8 }
  0x81   : > { %463 = vperm.xlu1 %4550, %v371_v11   ;;  %577 = vperm.xlu0 %4553, %v373_v17  }
  0x85   : > { %467 = vperm.xlu1 %4550, %v372_v19  }
  0x89   : > { %4551 = vset.pattern.permute.xlu1 %v4843_v0 }
  0x8a   : > { %512 = vperm.xlu1 %4551, %v370_v16  }
  0x8e   : > { %520 = vperm.xlu1 %4551, %v372_v19  }
  0x92   : > { %524 = vperm.xlu1 %4551, %v373_v17  }
  0x96   : > { %4554 = vset.pattern.permute.xlu1 %v4845_v6 }
  0x97   : > { %569 = vperm.xlu1 %4554, %v371_v11  }
  0x9b   : > { %573 = vperm.xlu1 %4554, %v372_v19  }
  0xcb   : > { %v394_v21 = vpop.permute.xlu1 %393  ;;  %v501_v22 = vpop.permute.xlu0 %500 }
  0xcc   : > { %v427_v55 = vmul.f32 %v5021_v40, %v394_v21  ;;  %v532_v0 = vmul.f32 %v5044_v56, %v501_v22 }
  0xce   : > { %v435_v3 = vadd.f32 %v5030_v47, %v427_v55 }
  0xcf   : > { %v399_v23 = vpop.permute.xlu1 %398 }
  0xd0   : > { %v550_v24 = vpop.permute.xlu0 %549  ;;  %v428_v57 = vmul.f32 %v5021_v40, %v399_v23 }
  0xd1   : > { %v584_v5 = vmul.f32 %v5050_v59, %v550_v24 }
  0xd2   : > { %v436_v4 = vadd.f32 %v5030_v47, %v428_v57 }
  0xd4   : > { %v448_v28 = vpop.permute.xlu1 %447  ;;  %v5016_v29 = vpop.permute.xlu0 %561 }
  0xd5   : > { %v479_v51 = vmul.f32 %v5035_v48, %v448_v28  ;;  %v587_v18 = vmul.f32 %v5050_v59, %v5016_v29  ;;  %v4564_v29 = vld [vmem:[#allocation3 + $0x8] sm:$0xff]  }
  0xd8   : > { %v452_v32 = vpop.permute.xlu1 %451 }
  0xd9   : > { %v384_v34 = vpop.permute.xlu0 %383  ;;  %v480_v62 = vmul.f32 %v5035_v48, %v452_v32 }
  0xda   : > { %v425_v43 = vmul.f32 %v5021_v40, %v384_v34  ;;  %v4567_v34 = vld [vmem:[#allocation3 + $0x20] sm:$0xff]  }
  0xdb   : > { %v488_v13 = vadd.f32 %v480_v62, %v435_v3 }
  0xdc   : > { %v433_v52 = vadd.f32 %v5030_v47, %v425_v43  ;;  %v4570_v43 = vld [vmem:[#allocation3 + $0x38] sm:$0xff]  }
  0xdd   : > { %v389_v37 = vpop.permute.xlu0 %388  ;;  %v497_v38 = vpop.permute.xlu1 %496 }
  0xde   : > { %v426_v41 = vmul.f32 %v5021_v40, %v389_v37  ;;  %v531_v1 = vmul.f32 %v5044_v56, %v497_v38  ;;  %v4568_v37 = vld [vmem:[#allocation3 + $0x28] sm:$0xff]  }
  0xe0   : > { %v434_v49 = vadd.f32 %v5030_v47, %v426_v41 }
  0xe1   : > { %v505_v44 = vpop.permute.xlu1 %504  ;;  %v5025_v45 = vpop.permute.xlu0 %408 }
  0xe2   : > { %v487_v60 = vadd.f32 %v479_v51, %v434_v49  ;;  %v533_v6 = vmul.f32 %v5044_v56, %v505_v44  ;;  %v430_v44 = vmul.f32 %v5021_v40, %v5025_v45 }
  0xe4   : > { %v540_v11 = vadd.f32 %v532_v0, %v487_v60  ;;  %v541_v21 = vadd.f32 %v533_v6, %v488_v13  ;;  %v438_v55 = vadd.f32 %v5030_v47, %v430_v44 }
  0xe5   : > { %v509_v53 = vpop.permute.xlu1 %508 }
  0xe6   : > { %v444_v58 = vpop.permute.xlu0 %443  ;;  %v534_v14 = vmul.f32 %v5044_v56, %v509_v53 }
  0xe7   : > { %v478_v61 = vmul.f32 %v5035_v48, %v444_v58 }
  0xe9   : > { %v486_v2 = vadd.f32 %v478_v61, %v433_v52 }
  0xea   : > { %v456_v7 = vpop.permute.xlu0 %455  ;;  %v554_v8 = vpop.permute.xlu1 %553 }
  0xeb   : > { %v539_v9 = vadd.f32 %v531_v1, %v486_v2  ;;  %v481_v10 = vmul.f32 %v5035_v48, %v456_v7  ;;  %v585_v12 = vmul.f32 %v5050_v59, %v554_v8  ;;  %v608_v7 = vld [vmem:[#allocation2] sm:$0x80] }
  0xed   : > { %v489_v15 = vadd.f32 %v481_v10, %v436_v4  ;;  %v5063_v16 = vadd.f32 %v584_v5, %v539_v9  ;;  %v5065_v17 = vadd.f32 %v585_v12, %v540_v11 }
  0xee   : > { %v558_v19 = vpop.permute.xlu1 %557  ;;  %v460_v36 = vpop.permute.xlu0 %459 }
  0xef   : > { %v542_v22 = vadd.f32 %v534_v14, %v489_v15  ;;  %v5071_v23 = vpack.c.bf16 %v5065_v17, %v5063_v16  ;;  %v586_v24 = vmul.f32 %v5050_v59, %v558_v19  ;;  %v482_v51 = vmul.f32 %v5035_v48, %v460_v36 }
  0xf1   : > { %v5074_v25 = vadd.f32 %v587_v18, %v542_v22  ;;  %v5076_v26 = vadd.f32 %v586_v24, %v541_v21  ;;  %4120 = vmatprep.mubr.bf16.mxu0 %v5071_v23  ;;  %v765_v1 = vshrl.u32 %v5071_v23, 16 }
  0xf3   : > { %v5081_v27 = vpack.c.bf16 %v5074_v25, %v5076_v26  ;;  %v404_v28 = vpop.permute.xlu1 %403  ;;  %v767_v14 = vrot.slane %v765_v1, 7 }
  0xf4   : > { %v429_v42 = vmul.f32 %v5021_v40, %v404_v28 }
  0xf5   : > { %4121 = vmatmul.mubr.bf16.vlgmr.msra.gmra.mrb[0].mxu0 %v5081_v27 }
  0xf6   : > { %4129 = vmatpush3.bf16.msra.mxu0 %v5011_v20  ;;  %v472_v20 = vpop.permute.xlu0 %471  ;;  %v437_v50 = vadd.f32 %v5030_v47, %v429_v42 }
  0xf7   : > { %v414_v30 = vpop.permute.xlu1 %413  ;;  %4130 = vmatprep.subr.bf16.mxu0 %v4564_v29  ;;  %v485_v2 = vmul.f32 %v5035_v48, %v472_v20 }
  0xf8   : > { %v431_v60 = vmul.f32 %v5021_v40, %v414_v30  ;;  %v490_v61 = vadd.f32 %v482_v51, %v437_v50  ;;  %v773_v30 = vshrl.u32 %v5081_v27, 16  ;;  %v4573_v51 = vld [vmem:[#allocation3 + $0x90] sm:$0xff]  }
  0xfa   : > { %4131 = vmatpush3.bf16.msra.mxu0 %v4564_v29  ;;  %v517_v46 = vpop.permute.xlu0 %516  ;;  %v439_v8 = vadd.f32 %v5030_v47, %v431_v60  ;;  %v775_v36 = vrot.slane %v773_v30, 7  ;;  %v4576_v60 = vld [vmem:[#allocation3 + $0xa8] sm:$0xff]  }
  0xfb   : > { %v419_v32 = vpop.permute.xlu1 %418  ;;  %4132 = vmatprep.subr.bf16.mxu0 %v4565_v31  ;;  %v536_v0 = vmul.f32 %v5044_v56, %v517_v46 }
  0xfc   : > { %v432_v52 = vmul.f32 %v5021_v40, %v419_v32 }
  0xfe   : > { %4133 = vmatpush3.bf16.msra.mxu0 %v4565_v31  ;;  %v566_v58 = vpop.permute.xlu0 %565  ;;  %v440_v62 = vadd.f32 %v5030_v47, %v432_v52  ;;  %v768_v47 = vshll.u32 %v5071_v23, 16 }
  0xff   : > { %4134 = vmatprep.subr.bf16.mxu0 %v4566_v33  ;;  %v588_v5 = vmul.f32 %v5050_v59, %v566_v58 }
 0x100   : > { %v464_v35 = vpop.permute.xlu1 %463  ;;  %v493_v12 = vadd.f32 %v485_v2, %v440_v62  ;;  %v4578_v62 = vld [vmem:[#allocation3 + $0xb8] sm:$0xff]  }
 0x101   : > { %v483_v53 = vmul.f32 %v5035_v48, %v464_v35  ;;  %v770_v35 = vor.u32 %v768_v47, %v767_v14 }
 0x102   : > { %4135 = vmatpush3.bf16.msra.mxu0 %v4566_v33  ;;  %v578_v6 = vpop.permute.xlu0 %577 }
 0x103   : > { %4136 = vmatprep.subr.bf16.mxu0 %v4567_v34  ;;  %v491_v63 = vadd.f32 %v483_v53, %v438_v55  ;;  %v591_v15 = vmul.f32 %v5050_v59, %v578_v6 }
 0x104   : > { %v468_v38 = vpop.permute.xlu1 %467 }
 0x105   : > { %v484_v3 = vmul.f32 %v5035_v48, %v468_v38  ;;  %v544_v10 = vadd.f32 %v536_v0, %v491_v63  ;;  %v761_v48 = vshrl.u32 %v608_v7, 16  ;;  %v776_v38 = vshll.u32 %v5081_v27, 16 }
 0x106   : > { %4137 = vmatpush3.bf16.msra.mxu0 %v4567_v34  ;;  %v941_v27 = vrot.slane %v768_v47, 1 }
 0x107   : > { %4138 = vmatprep.subr.bf16.mxu0 %v4568_v37  ;;  %v492_v18 = vadd.f32 %v484_v3, %v439_v8  ;;  %v763_v31 = vrot.slane %v761_v48, 7  ;;  %v778_v20 = vor.u32 %v776_v38, %v775_v36  ;;  %v946_v53 = vrot.slane %v776_v38, 1  ;;  %v5145_v38 = vld [vmem:[#allocation3 + $0xc0] sm:$0xff]  }
 0x108   : > { %v942_v55 = vor.u32 %v941_v27, %v765_v1  ;;  %v917_v1 = vld [vmem:[#allocation2 + $0x28] sm:$0x1]  ;;  %v4644_v27 = vld [vmem:[#allocation5 + $0xd4] ss:$8 sps:$4 sm:$0xff]  }
 0x109   : > { %v513_v41 = vpop.permute.xlu1 %512  ;;  %v779_v46 = vsel %vm759_vm0, %v767_v14, %v778_v20  ;;  %v950_v2 = vor.u32 %v946_v53, %v773_v30  ;;  %v4629_v20 = vld [vmem:[#allocation5 + $0x84] ss:$8 sps:$4 sm:$0xff]  }
 0x10a   : > { %4139 = vmatpush3.bf16.msra.mxu0 %v4568_v37  ;;  %v535_v57 = vmul.f32 %v5044_v56, %v513_v41 }
 0x10b   : > { %4140 = vmatprep.subr.bf16.mxu0 %v4569_v39 }
 0x10c   : > { %v543_v4 = vadd.f32 %v535_v57, %v490_v61  ;;  %v4574_v57 = vld [vmem:[#allocation3 + $0x98] sm:$0xff]   ;;  %v4577_v61 = vld [vmem:[#allocation3 + $0xb0] sm:$0xff]  }
 0x10d   : > { %v521_v49 = vpop.permute.xlu1 %520 }
 0x10e   : > { %4141 = vmatpush3.bf16.msra.mxu0 %v4569_v39  ;;  %v537_v11 = vmul.f32 %v5044_v56, %v521_v49  ;;  %v5109_v19 = vadd.f32 %v588_v5, %v543_v4  ;;  %v968_v5 = vshll.u32 %v917_v1, 16 }
 0x10f   : > { %4142 = vmatprep.subr.bf16.mxu0 %v4570_v43 }
 0x110   : > { %v545_v28 = vadd.f32 %v537_v11, %v492_v18  ;;  %v970_v7 = vrot.slane %v968_v5, 1  ;;  %v4602_v11 = vld [vmem:[#allocation5 + $0x70] ss:$8 sps:$4 sm:$0xff]   ;;  %v1293_v5 = vmul.f32 0.70710677, %v5076_v26 }
 0x111   : > { %v525_v45 = vpop.permute.xlu1 %524 }
 0x112   : > { %4143 = vmatpush3.bf16.msra.mxu0 %v4570_v43  ;;  %v538_v40 = vmul.f32 %v5044_v56, %v525_v45  ;;  %v4572_v43 = vld [vmem:[#allocation3 + $0x88] sm:$0xff]   ;;  %v947_v45 = vsel %vm935_vm1, %v942_v55, %v946_v53 }
 0x113   : > { %4152 = vmatprep.subr.bf16.mxu0 %v5092_v54  ;;  %v4647_v53 = vld [vmem:[#allocation5 + $0xe4] ss:$8 sps:$4 sm:$0xff]   ;;  %v4645_v55 = vld [vmem:[#allocation5 + $0xe0] ss:$8 sps:$4 sm:$0xff]  }
 0x114   : > { %v546_v21 = vadd.f32 %v538_v40, %v493_v12  ;;  %v4603_v12 = vld [vmem:[#allocation3 + $0x100] sm:$0xff]  }
 0x116   : > { %v570_v9 = vpop.permute.xlu1 %569  ;;  %v5120_v32 = vadd.f32 %v591_v15, %v546_v21 }
 0x117   : > { %v589_v13 = vmul.f32 %v5050_v59, %v570_v9  ;;  %v5139_v9 = vld [vmem:[#allocation2] sm:$0xff] }
 0x119   : > { %v5111_v22 = vadd.f32 %v589_v13, %v544_v10  ;;  %v4600_v10 = vld [vmem:[#allocation5 + $0x74] ss:$8 sps:$4 sm:$0xff]  }
 0x11a   : > { %v574_v24 = vpop.permute.xlu1 %573  ;;  %1211 = vmatprep.subr.bf16.mxu1 %v4600_v10 }
 0x11b   : > { %v5116_v56 = vpack.c.bf16 %v5111_v22, %v5109_v19  ;;  %v590_v29 = vmul.f32 %v5050_v59, %v574_v24  ;;  %v771_v59 = vsel %vm759_vm0, %v763_v31, %v770_v35  ;;  %1212 = vmatpush1.bf16.msra.mxu1 %v4602_v11  ;;  %v4604_v24 = vld [vmem:[#allocation3 + $0x108] sm:$0xff]   ;;  %v4606_v35 = vld [vmem:[#allocation3 + $0x118] sm:$0xff]  }
 0x11c   : > { %4176 = vmatprep.subr.bf16.mxu1 %v4603_v12 }
 0x11d   : > { %v5122_v33 = vadd.f32 %v590_v29, %v545_v28  ;;  %4124 = vmatprep.mubr.bf16.mxu0 %v5116_v56  ;;  %v781_v34 = vshrl.u32 %v5116_v56, 16  ;;  %v784_v39 = vshll.u32 %v5116_v56, 16 }
 0x11f   : > { %v603_v23 = vpack.c.bf16 %v5120_v32, %v5122_v33  ;;  %v783_v37 = vrot.slane %v781_v34, 7  ;;  %v954_v63 = vrot.slane %v784_v39, 1 }
 0x121   : > { %4125 = vmatmul.mubr.bf16.gmra.mrb[4].mxu0 %v603_v23  ;;  %v789_v41 = vshrl.u32 %v603_v23, 16  ;;  %v786_v42 = vor.u32 %v784_v39, %v783_v37  ;;  %v792_v50 = vshll.u32 %v603_v23, 16  ;;  %v958_v3 = vor.u32 %v954_v63, %v781_v34  ;;  %v4605_v34 = vld [vmem:[#allocation3 + $0x110] sm:$0xff]   ;;  %v4607_v23 = vld [vmem:[#allocation3 + $0x120] sm:$0xff]  }
 0x122   : > { %4144 = vmatprep.mubr.bf16.mxu0 %v771_v59  ;;  %v955_v4 = vsel %vm935_vm1, %v950_v2, %v954_v63  ;;  %v4610_v59 = vld [vmem:[#allocation3 + $0x138] sm:$0xff]   ;;  %v4627_v39 = vld [vmem:[#allocation5 + $0x80] ss:$8 sps:$4 sm:$0xff]  }
 0x123   : > { %v791_v44 = vrot.slane %v789_v41, 7  ;;  %v787_v49 = vsel %vm759_vm0, %v775_v36, %v786_v42  ;;  %v962_v0 = vrot.slane %v792_v50, 1  ;;  %v4608_v36 = vld [vmem:[#allocation3 + $0x128] sm:$0xff]   ;;  %v4630_v42 = vld [vmem:[#allocation5 + $0x90] ss:$8 sps:$4 sm:$0xff]  }
 0x125   : > { %v794_v52 = vor.u32 %v792_v50, %v791_v44  ;;  %v963_v40 = vsel %vm935_vm1, %v958_v3, %v962_v0  ;;  %v966_v6 = vor.u32 %v962_v0, %v789_v41  ;;  %v4632_v41 = vld [vmem:[#allocation5 + $0x94] ss:$8 sps:$4 sm:$0xff]   ;;  %v4633_v44 = vld [vmem:[#allocation5 + $0xa0] ss:$8 sps:$4 sm:$0xff]   ;;  %v4641_v50 = vld [vmem:[#allocation5 + $0xc4] ss:$8 sps:$4 sm:$0xff]  }
 0x126   : > { %v1292_v0 = vmul.f32 0.70710677, %v5065_v17 }
 0x127   : > { %v795_v58 = vsel %vm759_vm0, %v783_v37, %v794_v52  ;;  %v971_v8 = vsel %vm935_vm1, %v966_v6, %v970_v7  ;;  %v4609_v37 = vld [vmem:[#allocation3 + $0x130] sm:$0xff]  }
 0x128   : > { %v4642_v52 = vld [vmem:[#allocation5 + $0xd0] ss:$8 sps:$4 sm:$0xff]  }
 0x129   : > { %4145 = vmatmul.mubr.bf16.vlgmr.msra.gmra.mrb[0].mxu0 %v779_v46  ;;  %v4638_v46 = vld [vmem:[#allocation5 + $0xb4] ss:$8 sps:$4 sm:$0xff]  }
 0x12a   : > { %4153 = vmatpush3.bf16.msra.mxu0 %v5092_v54  ;;  %4148 = vmatprep.mubr.bf16.mxu0 %v787_v49  ;;  %v4575_v54 = vld [vmem:[#allocation3 + $0xa0] sm:$0xff]   ;;  %v4636_v49 = vld [vmem:[#allocation5 + $0xb0] ss:$8 sps:$4 sm:$0xff]  }
 0x12b   : > { %4154 = vmatprep.subr.bf16.mxu0 %v4572_v43 }
 0x12e   : > { %4155 = vmatpush3.bf16.msra.mxu0 %v4572_v43  ;;  %v4635_v43 = vld [vmem:[#allocation5 + $0xa4] ss:$8 sps:$4 sm:$0xff]  }
 0x12f   : > { %4156 = vmatprep.subr.bf16.mxu0 %v4573_v51 }
 0x131   : > { %4149 = vmatmul.mubr.bf16.gmra.mrb[4].mxu0 %v795_v58 }
 0x132   : > { %4157 = vmatpush3.bf16.msra.mxu0 %v4573_v51  ;;  %4168 = vmatprep.mubr.bf16.mxu0 %v947_v45  ;;  %v4639_v51 = vld [vmem:[#allocation5 + $0xc0] ss:$8 sps:$4 sm:$0xff]  }
 0x133   : > { %4158 = vmatprep.subr.bf16.mxu0 %v4574_v57 }
 0x136   : > { %4159 = vmatpush3.bf16.msra.mxu0 %v4574_v57  ;;  %v3790_v57 = vld [vmem:[%s5471_s4] ss:$0 sm:$0xff] }
 0x137   : > { %4160 = vmatprep.subr.bf16.mxu0 %v4575_v54 }
 0x13a   : > { %4161 = vmatpush3.bf16.msra.mxu0 %v4575_v54  ;;  %v1291_v54 = vmul.f32 0.70710677, %v5063_v16 }
 0x13b   : > { %4162 = vmatprep.subr.bf16.mxu0 %v4576_v60 }
 0x13e   : > { %4163 = vmatpush3.bf16.msra.mxu0 %v4576_v60 }
 0x13f   : > { %4164 = vmatprep.subr.bf16.mxu0 %v4577_v61 }
 0x142   : > { %4165 = vmatpush3.bf16.msra.mxu0 %v4577_v61 }
 0x143   : > { %4166 = vmatprep.subr.bf16.mxu0 %v4578_v62 }
 0x146   : > { %4167 = vmatpush3.bf16.msra.mxu0 %v4578_v62 }
 0x147   : > { %1863 = vmatprep.subr.bf16.mxu0 %v4629_v20  ;;  %v1298_v20 = vmul.f32 0.70710677, %v5120_v32 }
 0x149   : > { %4169 = vmatmul.mubr.bf16.vlgmr.msra.gmra.mrb[0].mxu0 %v955_v4 }
 0x14a   : > { %4172 = vmatprep.mubr.bf16.mxu0 %v963_v40  ;;  %1864 = vmatpush1.bf16.msra.mxu0 %v4627_v39 }
 0x14b   : > { %1865 = vmatprep.subr.bf16.mxu0 %v4632_v41  ;;  %v1315_v41 = vld [vmem:[#allocation2] sm:$0x80] }
 0x14e   : > { %1866 = vmatpush1.bf16.msra.mxu0 %v4630_v42 }
 0x14f   : > { %1867 = vmatprep.subr.bf16.mxu0 %v4635_v43 }
 0x151   : > { %4173 = vmatmul.mubr.bf16.gmra.mrb[4].mxu0 %v971_v8  ;;  %v1294_v8 = vmul.f32 0.70710677, %v5074_v25 }
 0x152   : > { %1895 = vmatprep.mubr.bf16.mxu0 %v5139_v9  ;;  %1868 = vmatpush1.bf16.msra.mxu0 %v4633_v44 }
 0x153   : > { %1869 = vmatprep.subr.bf16.mxu0 %v4638_v46 }
 0x156   : > { %1870 = vmatpush1.bf16.msra.mxu0 %v4636_v49 }
 0x157   : > { %1871 = vmatprep.subr.bf16.mxu0 %v4641_v50 }
 0x15a   : > { %1872 = vmatpush1.bf16.msra.mxu0 %v4639_v51  ;;  %v1474_v51 = vrot.slane %v1315_v41, 7  ;;  %v4654_v41 = vld [vmem:[#allocation3 + $0x1d8] sm:$0xff]  }
 0x15b   : > { %1873 = vmatprep.subr.bf16.mxu0 %v4644_v27  ;;  %v4616_v27 = vld [vmem:[#allocation3 + $0xe8] sm:$0xff]  }
 0x15e   : > { %1874 = vmatpush1.bf16.msra.mxu0 %v4642_v52 }
 0x15f   : > { %1875 = vmatprep.subr.bf16.mxu0 %v4647_v53 }
 0x162   : > { %1876 = vmatpush1.bf16.msra.mxu0 %v4645_v55  ;;  %v4617_v55 = vld [vmem:[#allocation3 + $0xf0] sm:$0xff]  }
 0x21c   : > { %v4170_v13 = vpop.f32.mrb[0].mxu0 }
 0x21d   : > { %v1058_v14 = vpop.f32.mrb[1].mxu0 }
 0x21e   : > { %v4171_v15 = vpop.f32.mrb[2].mxu0 }
 0x21f   : > { %v1098_v48 = vpack.c.bf16 %v4171_v15, %v4170_v13  ;;  %v1061_v18 = vpop.f32.mrb[3].mxu0  ;;  %v4612_v13 = vld [vmem:[#allocation3 + $0xc8] sm:$0xff]   ;;  %v1295_v15 = vmul.f32 0.70710677, %v5109_v19  ;;  %v4613_v19 = vld [vmem:[#allocation3 + $0xd0] sm:$0xff]  }
 0x220   : > { %v1097_v21 = vpack.c.bf16 %v1061_v18, %v1058_v14 }
 0x222   : > { %1230 = vmatmul.mubr.bf16.vlgmr.msra.gmra.mrb[0].mxu1 %v1097_v21 }
 0x223   : > { %1239 = vmatprep.mubr.bf16.mxu1 %v5139_v9  ;;  %4177 = vmatpush3.bf16.msra.mxu1 %v4603_v12 }
 0x224   : > { %v4174_v47 = vpop.f32.mrb[4].mxu0  ;;  %4178 = vmatprep.subr.bf16.mxu1 %v4604_v24 }
 0x225   : > { %v1074_v28 = vpop.f32.mrb[5].mxu0 }
 0x226   : > { %v4175_v56 = vpop.f32.mrb[6].mxu0 }
 0x227   : > { %v1100_v29 = vpack.c.bf16 %v4175_v56, %v4174_v47  ;;  %v1077_v30 = vpop.f32.mrb[7].mxu0  ;;  %4179 = vmatpush3.bf16.msra.mxu1 %v4604_v24 }
 0x228   : > { %v1099_v31 = vpack.c.bf16 %v1077_v30, %v1074_v28  ;;  %4180 = vmatprep.subr.bf16.mxu1 %v4605_v34  ;;  %v1296_v28 = vmul.f32 0.70710677, %v5111_v22 }
 0x22a   : > { %1240 = vmatmul.mubr.bf16.gmra.mrb[4].mxu1 %v1098_v48 }
 0x22b   : > { %1249 = vmatprep.mubr.bf16.mxu1 %v5139_v9  ;;  %4181 = vmatpush3.bf16.msra.mxu1 %v4605_v34  ;;  %v4614_v34 = vld [vmem:[#allocation3 + $0xd8] sm:$0xff]  }
 0x22c   : > { %4182 = vmatprep.subr.bf16.mxu1 %v4606_v35 }
 0x22f   : > { %4183 = vmatpush3.bf16.msra.mxu1 %v4606_v35 }
 0x230   : > { %4184 = vmatprep.subr.bf16.mxu1 %v4607_v23 }
 0x232   : > { %1250 = vmatmul.mubr.bf16.gmra.mrb[8].mxu1 %v1099_v31 }
 0x233   : > { %1259 = vmatprep.mubr.bf16.mxu1 %v5139_v9  ;;  %4185 = vmatpush3.bf16.msra.mxu1 %v4607_v23  ;;  %v1297_v23 = vmul.f32 0.70710677, %v5122_v33  ;;  %v4615_v33 = vld [vmem:[#allocation3 + $0xe0] sm:$0xff]  }
 0x234   : > { %4186 = vmatprep.subr.bf16.mxu1 %v4608_v36 }
 0x237   : > { %4187 = vmatpush3.bf16.msra.mxu1 %v4608_v36 }
 0x238   : > { %4188 = vmatprep.subr.bf16.mxu1 %v4609_v37 }
 0x23a   : > { %1260 = vmatmul.mubr.bf16.gmra.mrb[12].mxu1 %v1100_v29 }
 0x23b   : > { %4189 = vmatpush3.bf16.msra.mxu1 %v4609_v37 }
 0x23c   : > { %4190 = vmatprep.subr.bf16.mxu1 %v4610_v59 }
 0x23f   : > { %4191 = vmatpush3.bf16.msra.mxu1 %v4610_v59 }
 0x240   : > { %4200 = vmatprep.subr.bf16.mxu1 %v5145_v38 }
 0x2f5   : > { %v1231_v58 = vpop.f32.mrb[0].mxu1 }
 0x2f6   : > { %v1283_v45 = vadd.f32 %v3790_v57, %v1231_v58  ;;  %v5152_v60 = vpop.f32.mrb[1].mxu1  ;;  %v4618_v58 = vld [vmem:[#allocation3 + $0xf8] sm:$0xff]  }
 0x2f7   : > { %v1235_v61 = vpop.f32.mrb[2].mxu1 }
 0x2f8   : > { %v5154_v62 = vadd.f32 %v1291_v54, %v1283_v45  ;;  %v1284_v63 = vadd.f32 %v3790_v57, %v1235_v61  ;;  %v5157_v1 = vpop.f32.mrb[3].mxu1  ;;  %v4619_v45 = vld [vmem:[#allocation3 + $0x140] sm:$0xff]   ;;  %v4620_v54 = vld [vmem:[#allocation3 + $0x148] sm:$0xff]  }
 0x2fa   : > { %v5159_v2 = vadd.f32 %v1292_v0, %v1284_v63  ;;  %v4621_v0 = vld [vmem:[#allocation3 + $0x150] sm:$0xff]  }
 0x2fc   : > { %v5163_v3 = vpack.c.bf16 %v5159_v2, %v5154_v62 }
 0x2fd   : > { %v1241_v4 = vpop.f32.mrb[4].mxu1 }
 0x2fe   : > { %1311 = vst [vmem:[#allocation2 + $0x8] sm:$0xff] %v5163_v3  ;;  %v1285_v16 = vadd.f32 %v3790_v57, %v1241_v4  ;;  %v5167_v40 = vpop.f32.mrb[5].mxu1  ;;  %4192 = vmatprep.mubr.bf16.mxu1 %v5163_v3  ;;  %v1475_v18 = vrot.slane %v5163_v3, 7 }
 0x2ff   : > { %v1245_v6 = vpop.f32.mrb[6].mxu1 }
 0x300   : > { %v5170_v17 = vadd.f32 %v1293_v5, %v1285_v16  ;;  %v1286_v7 = vadd.f32 %v3790_v57, %v1245_v6  ;;  %v5173_v10 = vpop.f32.mrb[7].mxu1  ;;  %v1476_v52 = vsel %vm1473_vm2, %v1474_v51, %v1475_v18  ;;  %v4622_v16 = vld [vmem:[#allocation3 + $0x158] sm:$0xff]   ;;  %v5222_v51 = vld [vmem:[#allocation3 + $0x180] sm:$0xff]  }
 0x302   : > { %v5175_v11 = vadd.f32 %v1294_v8, %v1286_v7  ;;  %v4623_v7 = vld [vmem:[#allocation3 + $0x160] sm:$0xff]   ;;  %v4624_v8 = vld [vmem:[#allocation3 + $0x168] sm:$0xff]  }
 0x304   : > { %v5179_v12 = vpack.c.bf16 %v5175_v11, %v5170_v17 }
 0x305   : > { %v1251_v26 = vpop.f32.mrb[8].mxu1  ;;  %v1600_v63 = vld [vmem:[#allocation2 + $0x8] sm:$0xfe] }
 0x306   : > { %v1287_v14 = vadd.f32 %v3790_v57, %v1251_v26  ;;  %v5182_v48 = vpop.f32.mrb[9].mxu1  ;;  %4193 = vmatmul.mubr.bf16.vlgmr.msra.gmra.mrb[16].mxu1 %v5179_v12  ;;  %v1477_v25 = vrot.slane %v5179_v12, 7  ;;  %v1629_v59 = vrot.slane %v5179_v12, 1  ;;  %v1628_v4 = vrot.slane %v1600_v63, 1  ;;  %v4625_v12 = vld [vmem:[#allocation3 + $0x170] sm:$0xff]  }
 0x307   : > { %v1255_v21 = vpop.f32.mrb[10].mxu1  ;;  %4201 = vmatpush3.bf16.msra.mxu1 %v5145_v38  ;;  %v1604_v26 = vld [vmem:[#allocation2 + $0x28] sm:$0x1]  ;;  %v4692_v63 = vld [vmem:[#allocation5 + $0x154] ss:$8 sps:$4 sm:$0xff]  }
 0x308   : > { %v5188_v24 = vadd.f32 %v1295_v15, %v1287_v14  ;;  %v1288_v47 = vadd.f32 %v3790_v57, %v1255_v21  ;;  %v5191_v56 = vpop.f32.mrb[11].mxu1  ;;  %4202 = vmatprep.subr.bf16.mxu1 %v4612_v13  ;;  %v1478_v29 = vsel %vm1473_vm2, %v1475_v18, %v1477_v25  ;;  %v1630_v6 = vsel %vm1627_vm3, %v1628_v4, %v1629_v59  ;;  %v4650_v18 = vld [vmem:[#allocation5 + $0xf4] ss:$8 sps:$4 sm:$0xff]   ;;  %v4651_v21 = vld [vmem:[#allocation3 + $0x1c0] sm:$0xff]  }
 0x309   : > { %v1635_v14 = vrot.slane %v1604_v26, 1  ;;  %1877 = vmatprep.subr.bf16.mxu0 %v4650_v18  ;;  %v4693_v4 = vld [vmem:[#allocation5 + $0x160] ss:$8 sps:$4 sm:$0xff]  }
 0x30a   : > { %v5194_v30 = vadd.f32 %v1296_v28, %v1288_v47 }
 0x30b   : > { %4203 = vmatpush3.bf16.msra.mxu1 %v4612_v13  ;;  %v4626_v13 = vld [vmem:[#allocation3 + $0x178] sm:$0xff]  }
 0x30c   : > { %v1309_v31 = vpack.c.bf16 %v5194_v30, %v5188_v24  ;;  %4204 = vmatprep.subr.bf16.mxu1 %v4613_v19 }
 0x30d   : > { %v1261_v35 = vpop.f32.mrb[12].mxu1 }
 0x30e   : > { %v1289_v36 = vadd.f32 %v3790_v57, %v1261_v35  ;;  %v5199_v37 = vpop.f32.mrb[13].mxu1  ;;  %4196 = vmatprep.mubr.bf16.mxu1 %v1309_v31  ;;  %v1479_v22 = vrot.slane %v1309_v31, 7  ;;  %v1631_v38 = vrot.slane %v1309_v31, 1  ;;  %v4652_v35 = vld [vmem:[#allocation3 + $0x1c8] sm:$0xff]  }
 0x30f   : > { %v1265_v39 = vpop.f32.mrb[14].mxu1  ;;  %4205 = vmatpush3.bf16.msra.mxu1 %v4613_v19 }
 0x310   : > { %v5203_v42 = vadd.f32 %v1297_v23, %v1289_v36  ;;  %v1290_v43 = vadd.f32 %v3790_v57, %v1265_v39  ;;  %v5205_v44 = vpop.f32.mrb[15].mxu1  ;;  %4206 = vmatprep.subr.bf16.mxu1 %v4614_v34  ;;  %v1480_v46 = vsel %vm1473_vm2, %v1477_v25, %v1479_v22  ;;  %v1632_v49 = vsel %vm1627_vm3, %v1629_v59, %v1631_v38  ;;  %v4648_v25 = vld [vmem:[#allocation5 + $0xf0] ss:$8 sps:$4 sm:$0xff]  }
 0x311   : > { %1878 = vmatpush1.bf16.msra.mxu0 %v4648_v25 }
 0x312   : > { %v5209_v50 = vadd.f32 %v1298_v20, %v1290_v43  ;;  %4248 = vmatprep.subr.bf16.mxu0 %v4651_v21  ;;  %v4653_v20 = vld [vmem:[#allocation3 + $0x1d0] sm:$0xff]   ;;  %v4655_v43 = vld [vmem:[#allocation3 + $0x1e0] sm:$0xff]  }
 0x313   : > { %4207 = vmatpush3.bf16.msra.mxu1 %v4614_v34 }
 0x314   : > { %v1310_v32 = vpack.c.bf16 %v5209_v50, %v5203_v42  ;;  %4208 = vmatprep.subr.bf16.mxu1 %v4615_v33 }
 0x316   : > { %1314 = vst [vmem:[#allocation2 + $0x20] sm:$0xff] %v1310_v32  ;;  %4197 = vmatmul.mubr.bf16.gmra.mrb[20].mxu1 %v1310_v32  ;;  %v1633_v53 = vrot.slane %v1310_v32, 1  ;;  %v4675_v32 = vld [vmem:[#allocation5 + $0x100] ss:$8 sps:$4 sm:$0xff]  }
 0x317   : > { %4209 = vmatpush3.bf16.msra.mxu1 %v4615_v33  ;;  %4216 = vmatprep.mubr.bf16.mxu1 %v1476_v52  ;;  %v4656_v33 = vld [vmem:[#allocation3 + $0x1e8] sm:$0xff]   ;;  %v4680_v52 = vld [vmem:[#allocation5 + $0x114] ss:$8 sps:$4 sm:$0xff]  }
 0x318   : > { %4210 = vmatprep.subr.bf16.mxu1 %v4616_v27  ;;  %v1634_v57 = vsel %vm1627_vm3, %v1631_v38, %v1633_v53  ;;  %v1636_v15 = vsel %vm1627_vm3, %v1633_v53, %v1635_v14  ;;  %v4678_v53 = vld [vmem:[#allocation5 + $0x110] ss:$8 sps:$4 sm:$0xff]  }
 0x31b   : > { %4211 = vmatpush3.bf16.msra.mxu1 %v4616_v27  ;;  %v4677_v27 = vld [vmem:[#allocation5 + $0x104] ss:$8 sps:$4 sm:$0xff]  }
 0x31c   : > { %4212 = vmatprep.subr.bf16.mxu1 %v4617_v55 }
 0x31d   : > { %v1319_v61 = vld [vmem:[#allocation2 + $0x20] sm:$0x7f] }
 0x31e   : > { %v1481_v3 = vrot.slane %v1319_v61, 7  ;;  %v4687_v61 = vld [vmem:[#allocation5 + $0x140] ss:$8 sps:$4 sm:$0xff]  }
 0x31f   : > { %4213 = vmatpush3.bf16.msra.mxu1 %v4617_v55  ;;  %v4683_v55 = vld [vmem:[#allocation5 + $0x124] ss:$8 sps:$4 sm:$0xff]  }
 0x320   : > { %4214 = vmatprep.subr.bf16.mxu1 %v4618_v58  ;;  %v1482_v5 = vsel %vm1473_vm2, %v1479_v22, %v1481_v3  ;;  %v4695_v3 = vld [vmem:[#allocation5 + $0x164] ss:$8 sps:$4 sm:$0xff]  }
 0x323   : > { %4215 = vmatpush3.bf16.msra.mxu1 %v4618_v58  ;;  %v4686_v58 = vld [vmem:[#allocation5 + $0x134] ss:$8 sps:$4 sm:$0xff]  }
 0x324   : > { %4224 = vmatprep.subr.bf16.mxu1 %v4619_v45 }
 0x326   : > { %4217 = vmatmul.mubr.bf16.vlgmr.msra.gmra.mrb[16].mxu1 %v1478_v29 }
 0x327   : > { %4220 = vmatprep.mubr.bf16.mxu1 %v1480_v46  ;;  %4225 = vmatpush3.bf16.msra.mxu1 %v4619_v45  ;;  %v4657_v46 = vld [vmem:[#allocation3 + $0x1f0] sm:$0xff]  }
 0x328   : > { %4226 = vmatprep.subr.bf16.mxu1 %v4620_v54  ;;  %v4684_v45 = vld [vmem:[#allocation5 + $0x130] ss:$8 sps:$4 sm:$0xff]  }
 0x32b   : > { %4227 = vmatpush3.bf16.msra.mxu1 %v4620_v54  ;;  %v4689_v54 = vld [vmem:[#allocation5 + $0x144] ss:$8 sps:$4 sm:$0xff]  }
 0x32c   : > { %4228 = vmatprep.subr.bf16.mxu1 %v4621_v0 }
 0x32e   : > { %4221 = vmatmul.mubr.bf16.gmra.mrb[20].mxu1 %v1482_v5 }
 0x32f   : > { %4229 = vmatpush3.bf16.msra.mxu1 %v4621_v0  ;;  %4240 = vmatprep.mubr.bf16.mxu1 %v1630_v6  ;;  %v4690_v0 = vld [vmem:[#allocation5 + $0x150] ss:$8 sps:$4 sm:$0xff]  }
 0x330   : > { %4230 = vmatprep.subr.bf16.mxu1 %v4622_v16 }
 0x333   : > { %4231 = vmatpush3.bf16.msra.mxu1 %v4622_v16  ;;  %v5228_v16 = vld [vmem:[%s5471_s4 + $0x1] ss:$0 sm:$0xff] }
 0x334   : > { %4232 = vmatprep.subr.bf16.mxu1 %v4623_v7 }
 0x337   : > { %4233 = vmatpush3.bf16.msra.mxu1 %v4623_v7  ;;  %v1957_v7 = vmul.f32 0.70710677, %v5154_v62 }
 0x338   : > { %4234 = vmatprep.subr.bf16.mxu1 %v4624_v8 }
 0x33b   : > { %4235 = vmatpush3.bf16.msra.mxu1 %v4624_v8 }
 0x33c   : > { %4236 = vmatprep.subr.bf16.mxu1 %v4625_v12 }
 0x33f   : > { %4237 = vmatpush3.bf16.msra.mxu1 %v4625_v12 }
 0x340   : > { %4238 = vmatprep.subr.bf16.mxu1 %v4626_v13 }
 0x343   : > { %4239 = vmatpush3.bf16.msra.mxu1 %v4626_v13 }
 0x344   : > { %2570 = vmatprep.subr.bf16.mxu1 %v4677_v27 }
 0x346   : > { %4241 = vmatmul.mubr.bf16.vlgmr.msra.gmra.mrb[16].mxu1 %v1632_v49  ;;  %v4658_v49 = vld [vmem:[#allocation3 + $0x1f8] sm:$0xff]  }
 0x347   : > { %4244 = vmatprep.mubr.bf16.mxu1 %v1634_v57  ;;  %2571 = vmatpush1.bf16.msra.mxu1 %v4675_v32  ;;  %v4681_v57 = vld [vmem:[#allocation5 + $0x120] ss:$8 sps:$4 sm:$0xff]  }
 0x348   : > { %2572 = vmatprep.subr.bf16.mxu1 %v4680_v52 }
 0x34b   : > { %2573 = vmatpush1.bf16.msra.mxu1 %v4678_v53 }
 0x34c   : > { %2574 = vmatprep.subr.bf16.mxu1 %v4683_v55 }
 0x34e   : > { %4245 = vmatmul.mubr.bf16.gmra.mrb[20].mxu1 %v1636_v15  ;;  %v1958_v15 = vmul.f32 0.70710677, %v5159_v2 }
 0x34f   : > { %2602 = vmatprep.mubr.bf16.mxu1 %v5139_v9  ;;  %2575 = vmatpush1.bf16.msra.mxu1 %v4681_v57 }
 0x350   : > { %2576 = vmatprep.subr.bf16.mxu1 %v4686_v58 }
 0x353   : > { %2577 = vmatpush1.bf16.msra.mxu1 %v4684_v45 }
 0x354   : > { %2578 = vmatprep.subr.bf16.mxu1 %v4689_v54  ;;  %v1981_v54 = vld [vmem:[#allocation2] sm:$0x80] }
 0x357   : > { %2579 = vmatpush1.bf16.msra.mxu1 %v4687_v61 }
 0x358   : > { %2580 = vmatprep.subr.bf16.mxu1 %v4692_v63  ;;  %v4662_v63 = vld [vmem:[#allocation3 + $0x198] sm:$0xff]  }
 0x35b   : > { %2581 = vmatpush1.bf16.msra.mxu1 %v4690_v0 }
 0x35c   : > { %2582 = vmatprep.subr.bf16.mxu1 %v4695_v3 }
 0x35f   : > { %2583 = vmatpush1.bf16.msra.mxu1 %v4693_v4  ;;  %v2134_v4 = vshrl.u32 %v1981_v54, 16  ;;  %v2290_v54 = vld [vmem:[#allocation2 + $0x28] sm:$0x1] }
 0x419   : > { %v4242_v47 = vpop.f32.mrb[16].mxu1 }
 0x41a   : > { %v1723_v28 = vpop.f32.mrb[17].mxu1 }
 0x41b   : > { %v4243_v19 = vpop.f32.mrb[18].mxu1 }
 0x41c   : > { %v1763_v29 = vpack.c.bf16 %v4243_v19, %v4242_v47  ;;  %v1726_v31 = vpop.f32.mrb[19].mxu1 }
 0x41d   : > { %v1762_v34 = vpack.c.bf16 %v1726_v31, %v1723_v28  ;;  %v1959_v28 = vmul.f32 0.70710677, %v5170_v17 }
 0x41f   : > { %1896 = vmatmul.mubr.bf16.vlgmr.msra.gmra.mrb[8].mxu0 %v1762_v34 }
 0x420   : > { %1905 = vmatprep.mubr.bf16.mxu0 %v5139_v9  ;;  %4249 = vmatpush3.bf16.msra.mxu0 %v4651_v21 }
 0x421   : > { %v4246_v23 = vpop.f32.mrb[20].mxu1  ;;  %4250 = vmatprep.subr.bf16.mxu0 %v4652_v35 }
 0x422   : > { %v1739_v36 = vpop.f32.mrb[21].mxu1 }
 0x423   : > { %v4247_v22 = vpop.f32.mrb[22].mxu1 }
 0x424   : > { %v1765_v59 = vpack.c.bf16 %v4247_v22, %v4246_v23  ;;  %v1742_v38 = vpop.f32.mrb[23].mxu1  ;;  %4251 = vmatpush3.bf16.msra.mxu0 %v4652_v35  ;;  %v1960_v35 = vmul.f32 0.70710677, %v5175_v11  ;;  %v1961_v11 = vmul.f32 0.70710677, %v5188_v24  ;;  %v4661_v24 = vld [vmem:[#allocation3 + $0x190] sm:$0xff]  }
 0x425   : > { %v1764_v39 = vpack.c.bf16 %v1742_v38, %v1739_v36  ;;  %4252 = vmatprep.subr.bf16.mxu0 %v4653_v20 }
 0x427   : > { %1906 = vmatmul.mubr.bf16.gmra.mrb[12].mxu0 %v1763_v29 }
 0x428   : > { %1915 = vmatprep.mubr.bf16.mxu0 %v5139_v9  ;;  %4253 = vmatpush3.bf16.msra.mxu0 %v4653_v20 }
 0x429   : > { %4254 = vmatprep.subr.bf16.mxu0 %v4654_v41 }
 0x42c   : > { %4255 = vmatpush3.bf16.msra.mxu0 %v4654_v41 }
 0x42d   : > { %4256 = vmatprep.subr.bf16.mxu0 %v4655_v43 }
 0x42f   : > { %1916 = vmatmul.mubr.bf16.gmra.mrb[16].mxu0 %v1764_v39 }
 0x430   : > { %1925 = vmatprep.mubr.bf16.mxu0 %v5139_v9  ;;  %4257 = vmatpush3.bf16.msra.mxu0 %v4655_v43 }
 0x431   : > { %4258 = vmatprep.subr.bf16.mxu0 %v4656_v33 }
 0x434   : > { %4259 = vmatpush3.bf16.msra.mxu0 %v4656_v33 }
 0x435   : > { %4260 = vmatprep.subr.bf16.mxu0 %v4657_v46 }
 0x437   : > { %1926 = vmatmul.mubr.bf16.gmra.mrb[20].mxu0 %v1765_v59  ;;  %v4660_v59 = vld [vmem:[#allocation3 + $0x188] sm:$0xff]  }
 0x438   : > { %4261 = vmatpush3.bf16.msra.mxu0 %v4657_v46 }
 0x439   : > { %4262 = vmatprep.subr.bf16.mxu0 %v4658_v49 }
 0x43c   : > { %4263 = vmatpush3.bf16.msra.mxu0 %v4658_v49  ;;  %v1962_v49 = vmul.f32 0.70710677, %v5194_v30 }
 0x43d   : > { %4272 = vmatprep.subr.bf16.mxu0 %v5222_v51 }
 0x4f2   : > { %v1897_v5 = vpop.f32.mrb[8].mxu0 }
 0x4f3   : > { %v1949_v6 = vadd.f32 %v5228_v16, %v1897_v5  ;;  %v1899_v8 = vpop.f32.mrb[9].mxu0  ;;  %v1963_v5 = vmul.f32 0.70710677, %v5203_v42  ;;  %v4663_v42 = vld [vmem:[#allocation3 + $0x1a0] sm:$0xff]  }
 0x4f4   : > { %v5233_v12 = vadd.f32 %v1899_v8, %v5152_v60  ;;  %v1901_v13 = vpop.f32.mrb[10].mxu0 }
 0x4f5   : > { %v5235_v26 = vadd.f32 %v1957_v7, %v1949_v6  ;;  %v1950_v14 = vadd.f32 %v5228_v16, %v1901_v13  ;;  %v1903_v18 = vpop.f32.mrb[11].mxu0 }
 0x4f6   : > { %v5240_v25 = vadd.f32 %v1903_v18, %v5157_v1 }
 0x4f7   : > { %v5242_v21 = vadd.f32 %v1958_v15, %v1950_v14  ;;  %v1964_v15 = vmul.f32 0.70710677, %v5209_v50 }
 0x4f9   : > { %v5246_v62 = vpack.c.bf16 %v5242_v21, %v5235_v26 }
 0x4fa   : > { %v1907_v47 = vpop.f32.mrb[12].mxu0 }
 0x4fb   : > { %v1951_v60 = vadd.f32 %v5228_v16, %v1907_v47  ;;  %v1909_v19 = vpop.f32.mrb[13].mxu0  ;;  %4264 = vmatprep.mubr.bf16.mxu0 %v5246_v62  ;;  %v2141_v1 = vshll.u32 %v5246_v62, 16  ;;  %v2138_v39 = vshrl.u32 %v5246_v62, 16 }
 0x4fc   : > { %v5252_v2 = vadd.f32 %v1909_v19, %v5167_v40  ;;  %v1911_v29 = vpop.f32.mrb[14].mxu0 }
 0x4fd   : > { %v5255_v31 = vadd.f32 %v1959_v28, %v1951_v60  ;;  %v1952_v34 = vadd.f32 %v5228_v16, %v1911_v29  ;;  %v1913_v23 = vpop.f32.mrb[15].mxu0  ;;  %v2313_v22 = vrot.slane %v2141_v1, 1 }
 0x4fe   : > { %v5260_v36 = vadd.f32 %v1913_v23, %v5173_v10 }
 0x4ff   : > { %v5262_v17 = vadd.f32 %v1960_v35, %v1952_v34  ;;  %v2314_v32 = vor.u32 %v2313_v22, %v2138_v39  ;;  %v2136_v35 = vrot.slane %v2134_v4, 7  ;;  %v4699_v4 = vld [vmem:[#allocation3 + $0x280] sm:$0xff]  }
 0x501   : > { %v1974_v40 = vpack.c.bf16 %v5262_v17, %v5255_v31 }
 0x502   : > { %v1917_v38 = vpop.f32.mrb[16].mxu0 }
 0x503   : > { %v1953_v20 = vadd.f32 %v5228_v16, %v1917_v38  ;;  %v1919_v41 = vpop.f32.mrb[17].mxu0  ;;  %4265 = vmatmul.mubr.bf16.vlgmr.msra.gmra.mrb[24].mxu0 %v1974_v40  ;;  %v2146_v10 = vshrl.u32 %v1974_v40, 16  ;;  %v2149_v43 = vshll.u32 %v1974_v40, 16  ;;  %v4664_v40 = vld [vmem:[#allocation3 + $0x1a8] sm:$0xff]  }
 0x504   : > { %v5272_v33 = vadd.f32 %v1919_v41, %v5182_v48  ;;  %v1921_v46 = vpop.f32.mrb[18].mxu0  ;;  %4273 = vmatpush3.bf16.msra.mxu0 %v5222_v51  ;;  %v2140_v48 = vrot.slane %v2138_v39, 7 }
 0x505   : > { %v5276_v27 = vadd.f32 %v1961_v11, %v1953_v20  ;;  %v1954_v52 = vadd.f32 %v5228_v16, %v1921_v46  ;;  %v1923_v53 = vpop.f32.mrb[19].mxu0  ;;  %v2148_v55 = vrot.slane %v2146_v10, 7  ;;  %4274 = vmatprep.subr.bf16.mxu0 %v4660_v59  ;;  %v2318_v57 = vrot.slane %v2149_v43, 1 }
 0x506   : > { %v5280_v58 = vadd.f32 %v1923_v53, %v5191_v56  ;;  %v2143_v50 = vor.u32 %v2141_v1, %v2140_v48  ;;  %v4665_v1 = vld [vmem:[#allocation3 + $0x1b0] sm:$0xff]   ;;  %v4670_v53 = vld [vmem:[#allocation3 + $0x218] sm:$0xff]  }
 0x507   : > { %v5282_v45 = vadd.f32 %v1962_v49, %v1954_v52  ;;  %v2151_v30 = vor.u32 %v2149_v43, %v2148_v55  ;;  %v5285_v51 = vsel %vm935_vm1, %v2314_v32, %v2318_v57  ;;  %v2322_v18 = vor.u32 %v2318_v57, %v2146_v10  ;;  %v4666_v43 = vld [vmem:[#allocation3 + $0x1b8] sm:$0xff]   ;;  %v4667_v49 = vld [vmem:[#allocation3 + $0x200] sm:$0xff]   ;;  %v4668_v32 = vld [vmem:[#allocation3 + $0x208] sm:$0xff]  }
 0x508   : > { %4275 = vmatpush3.bf16.msra.mxu0 %v4660_v59  ;;  %v2144_v39 = vsel %vm759_vm0, %v2136_v35, %v2143_v50  ;;  %v4669_v52 = vld [vmem:[#allocation3 + $0x210] sm:$0xff]   ;;  %v4702_v50 = vld [vmem:[#allocation3 + $0x298] sm:$0xff]  }
 0x509   : > { %v1975_v61 = vpack.c.bf16 %v5282_v45, %v5276_v27  ;;  %4276 = vmatprep.subr.bf16.mxu0 %v4661_v24  ;;  %v2152_v0 = vsel %vm759_vm0, %v2140_v48, %v2151_v30  ;;  %v4673_v57 = vld [vmem:[#allocation3 + $0x230] sm:$0xff]   ;;  %v4674_v48 = vld [vmem:[#allocation3 + $0x238] sm:$0xff]   ;;  %v2340_v30 = vshll.u32 %v2290_v54, 16 }
 0x50a   : > { %v1927_v3 = vpop.f32.mrb[20].mxu0  ;;  %v4701_v35 = vld [vmem:[#allocation3 + $0x290] sm:$0xff]  }
 0x50b   : > { %v1955_v56 = vadd.f32 %v5228_v16, %v1927_v3  ;;  %v1929_v6 = vpop.f32.mrb[21].mxu0  ;;  %4268 = vmatprep.mubr.bf16.mxu0 %v1975_v61  ;;  %v2154_v7 = vshrl.u32 %v1975_v61, 16  ;;  %v2157_v8 = vshll.u32 %v1975_v61, 16  ;;  %v4696_v3 = vld [vmem:[#allocation5 + $0x170] ss:$8 sps:$4 sm:$0xff]  }
 0x50c   : > { %v5293_v13 = vadd.f32 %v1929_v6, %v5199_v37  ;;  %v1931_v14 = vpop.f32.mrb[22].mxu0  ;;  %4277 = vmatpush3.bf16.msra.mxu0 %v4661_v24  ;;  %v4672_v24 = vld [vmem:[#allocation3 + $0x228] sm:$0xff]  }
 0x50d   : > { %v5296_v47 = vadd.f32 %v1963_v5, %v1955_v56  ;;  %v1956_v60 = vadd.f32 %v5228_v16, %v1931_v14  ;;  %v1933_v28 = vpop.f32.mrb[23].mxu0  ;;  %v2156_v19 = vrot.slane %v2154_v7, 7  ;;  %4278 = vmatprep.subr.bf16.mxu0 %v4662_v63  ;;  %v2326_v29 = vrot.slane %v2157_v8, 1 }
 0x50e   : > { %v5300_v34 = vadd.f32 %v1933_v28, %v5205_v44 }
 0x50f   : > { %v5302_v37 = vadd.f32 %v1964_v15, %v1956_v60  ;;  %v2159_v23 = vor.u32 %v2157_v8, %v2156_v19  ;;  %v2327_v22 = vsel %vm935_vm1, %v2322_v18, %v2326_v29  ;;  %v2330_v20 = vor.u32 %v2326_v29, %v2154_v7  ;;  %v4700_v15 = vld [vmem:[#allocation3 + $0x288] sm:$0xff]  }
 0x510   : > { %4279 = vmatpush3.bf16.msra.mxu0 %v4662_v63 }
 0x511   : > { %v1976_v16 = vpack.c.bf16 %v5302_v37, %v5296_v47  ;;  %4280 = vmatprep.subr.bf16.mxu0 %v4663_v42  ;;  %v2160_v59 = vsel %vm759_vm0, %v2148_v55, %v2159_v23  ;;  %v4671_v55 = vld [vmem:[#allocation3 + $0x220] sm:$0xff]  }
 0x512   : > { %v4703_v23 = vld [vmem:[#allocation3 + $0x2a0] sm:$0xff]  }
 0x513   : > { %4269 = vmatmul.mubr.bf16.gmra.mrb[28].mxu0 %v1976_v16  ;;  %v2162_v44 = vshrl.u32 %v1976_v16, 16  ;;  %v2165_v38 = vshll.u32 %v1976_v16, 16  ;;  %v4705_v16 = vld [vmem:[#allocation3 + $0x2b0] sm:$0xff]  }
 0x514   : > { %4281 = vmatpush3.bf16.msra.mxu0 %v4663_v42  ;;  %4288 = vmatprep.mubr.bf16.mxu0 %v2144_v39  ;;  %v4726_v39 = vld [vmem:[#allocation5 + $0x190] ss:$8 sps:$4 sm:$0xff]  }
 0x515   : > { %v2164_v62 = vrot.slane %v2162_v44, 7  ;;  %4282 = vmatprep.subr.bf16.mxu0 %v4664_v40  ;;  %v2334_v11 = vrot.slane %v2165_v38, 1 }
 0x517   : > { %v2167_v41 = vor.u32 %v2165_v38, %v2164_v62  ;;  %v2335_v10 = vsel %vm935_vm1, %v2330_v20, %v2334_v11  ;;  %v2338_v61 = vor.u32 %v2334_v11, %v2162_v44  ;;  %v4725_v44 = vld [vmem:[#allocation5 + $0x184] ss:$8 sps:$4 sm:$0xff]   ;;  %v4728_v38 = vld [vmem:[#allocation5 + $0x194] ss:$8 sps:$4 sm:$0xff]   ;;  %v4732_v11 = vld [vmem:[#allocation5 + $0x1b0] ss:$8 sps:$4 sm:$0xff]  }
 0x518   : > { %4283 = vmatpush3.bf16.msra.mxu0 %v4664_v40  ;;  %v4706_v40 = vld [vmem:[#allocation3 + $0x2b8] sm:$0xff]   ;;  %v4731_v62 = vld [vmem:[#allocation5 + $0x1a4] ss:$8 sps:$4 sm:$0xff]  }
 0x519   : > { %4284 = vmatprep.subr.bf16.mxu0 %v4665_v1  ;;  %v2168_v46 = vsel %vm759_vm0, %v2156_v19, %v2167_v41  ;;  %v4734_v20 = vld [vmem:[#allocation5 + $0x1b4] ss:$8 sps:$4 sm:$0xff]   ;;  %v4737_v41 = vld [vmem:[#allocation5 + $0x1c4] ss:$8 sps:$4 sm:$0xff]  }
 0x51c   : > { %4285 = vmatpush3.bf16.msra.mxu0 %v4665_v1  ;;  %v4729_v1 = vld [vmem:[#allocation5 + $0x1a0] ss:$8 sps:$4 sm:$0xff]  }
 0x51d   : > { %4286 = vmatprep.subr.bf16.mxu0 %v4666_v43 }
 0x520   : > { %4287 = vmatpush3.bf16.msra.mxu0 %v4666_v43  ;;  %v4740_v43 = vld [vmem:[#allocation5 + $0x1d4] ss:$8 sps:$4 sm:$0xff]  }
 0x521   : > { %4296 = vmatprep.subr.bf16.mxu0 %v4667_v49 }
 0x523   : > { %4289 = vmatmul.mubr.bf16.vlgmr.msra.gmra.mrb[24].mxu0 %v2152_v0  ;;  %v4698_v0 = vld [vmem:[#allocation5 + $0x174] ss:$8 sps:$4 sm:$0xff]  }
 0x524   : > { %4292 = vmatprep.mubr.bf16.mxu0 %v2160_v59  ;;  %4297 = vmatpush3.bf16.msra.mxu0 %v4667_v49  ;;  %v4723_v59 = vld [vmem:[#allocation5 + $0x180] ss:$8 sps:$4 sm:$0xff]   ;;  %v4743_v49 = vld [vmem:[#allocation5 + $0x1e4] ss:$8 sps:$4 sm:$0xff]  }
 0x525   : > { %4298 = vmatprep.subr.bf16.mxu0 %v4668_v32  ;;  %2584 = vmatprep.subr.bf16.mxu1 %v4698_v0 }
 0x526   : > { %2585 = vmatpush1.bf16.msra.mxu1 %v4696_v3 }
 0x527   : > { %4320 = vmatprep.subr.bf16.mxu1 %v4699_v4 }
 0x528   : > { %4299 = vmatpush3.bf16.msra.mxu0 %v4668_v32  ;;  %v4741_v32 = vld [vmem:[#allocation5 + $0x1e0] ss:$8 sps:$4 sm:$0xff]  }
 0x529   : > { %4300 = vmatprep.subr.bf16.mxu0 %v4669_v52 }
 0x52b   : > { %4293 = vmatmul.mubr.bf16.gmra.mrb[28].mxu0 %v2168_v46  ;;  %v4738_v46 = vld [vmem:[#allocation5 + $0x1d0] ss:$8 sps:$4 sm:$0xff]  }
 0x52c   : > { %4301 = vmatpush3.bf16.msra.mxu0 %v4669_v52  ;;  %4312 = vmatprep.mubr.bf16.mxu0 %v5285_v51  ;;  %v2342_v51 = vrot.slane %v2340_v30, 1  ;;  %v5325_v52 = vld [vmem:[%s5471_s4 + $0x2] ss:$0 sm:$0xff] }
 0x52d   : > { %4302 = vmatprep.subr.bf16.mxu0 %v4670_v53 }
 0x52e   : > { %v2343_v63 = vsel %vm935_vm1, %v2338_v61, %v2342_v51  ;;  %v2665_v51 = vmul.f32 0.70710677, %v5242_v21 }
 0x530   : > { %4303 = vmatpush3.bf16.msra.mxu0 %v4670_v53 }
 0x531   : > { %4304 = vmatprep.subr.bf16.mxu0 %v4671_v55 }
 0x534   : > { %4305 = vmatpush3.bf16.msra.mxu0 %v4671_v55 }
 0x535   : > { %4306 = vmatprep.subr.bf16.mxu0 %v4672_v24 }
 0x538   : > { %4307 = vmatpush3.bf16.msra.mxu0 %v4672_v24  ;;  %v2664_v24 = vmul.f32 0.70710677, %v5235_v26 }
 0x539   : > { %4308 = vmatprep.subr.bf16.mxu0 %v4673_v57 }
 0x53c   : > { %4309 = vmatpush3.bf16.msra.mxu0 %v4673_v57 }
 0x53d   : > { %4310 = vmatprep.subr.bf16.mxu0 %v4674_v48 }
 0x540   : > { %4311 = vmatpush3.bf16.msra.mxu0 %v4674_v48 }
 0x541   : > { %3234 = vmatprep.subr.bf16.mxu0 %v4725_v44 }
 0x543   : > { %4313 = vmatmul.mubr.bf16.vlgmr.msra.gmra.mrb[24].mxu0 %v2327_v22  ;;  %v4704_v22 = vld [vmem:[#allocation3 + $0x2a8] sm:$0xff]  }
 0x544   : > { %4316 = vmatprep.mubr.bf16.mxu0 %v2335_v10  ;;  %3235 = vmatpush1.bf16.msra.mxu0 %v4723_v59  ;;  %v4735_v10 = vld [vmem:[#allocation5 + $0x1c0] ss:$8 sps:$4 sm:$0xff]  }
 0x545   : > { %3236 = vmatprep.subr.bf16.mxu0 %v4728_v38  ;;  %v4710_v38 = vld [vmem:[#allocation3 + $0x258] sm:$0xff]  }
 0x548   : > { %3237 = vmatpush1.bf16.msra.mxu0 %v4726_v39 }
 0x549   : > { %3238 = vmatprep.subr.bf16.mxu0 %v4731_v62 }
 0x54b   : > { %4317 = vmatmul.mubr.bf16.gmra.mrb[28].mxu0 %v2343_v63 }
 0x54c   : > { %3266 = vmatprep.mubr.bf16.mxu0 %v5139_v9  ;;  %3239 = vmatpush1.bf16.msra.mxu0 %v4729_v1 }
 0x54d   : > { %3240 = vmatprep.subr.bf16.mxu0 %v4734_v20 }
 0x550   : > { %3241 = vmatpush1.bf16.msra.mxu0 %v4732_v11 }
 0x551   : > { %3242 = vmatprep.subr.bf16.mxu0 %v4737_v41 }
 0x554   : > { %3243 = vmatpush1.bf16.msra.mxu0 %v4735_v10  ;;  %v2671_v10 = vmul.f32 0.70710677, %v5302_v37  ;;  %v4712_v37 = vld [vmem:[#allocation3 + $0x268] sm:$0xff]  }
 0x555   : > { %3244 = vmatprep.subr.bf16.mxu0 %v4740_v43  ;;  %v2688_v43 = vld [vmem:[#allocation2] sm:$0x80] }
 0x558   : > { %3245 = vmatpush1.bf16.msra.mxu0 %v4738_v46 }
 0x559   : > { %3246 = vmatprep.subr.bf16.mxu0 %v4743_v49 }
 0x55c   : > { %3247 = vmatpush1.bf16.msra.mxu0 %v4741_v32  ;;  %v4711_v32 = vld [vmem:[#allocation3 + $0x260] sm:$0xff]  }
 0x616   : > { %v4314_v56 = vpop.f32.mrb[24].mxu0 }
 0x617   : > { %v2430_v5 = vpop.f32.mrb[25].mxu0 }
 0x618   : > { %v4315_v6 = vpop.f32.mrb[26].mxu0 }
 0x619   : > { %v2470_v7 = vpack.c.bf16 %v4315_v6, %v4314_v56  ;;  %v2433_v8 = vpop.f32.mrb[27].mxu0 }
 0x61a   : > { %v2469_v14 = vpack.c.bf16 %v2433_v8, %v2430_v5  ;;  %v2667_v8 = vmul.f32 0.70710677, %v5262_v17 }
 0x61c   : > { %2603 = vmatmul.mubr.bf16.vlgmr.msra.gmra.mrb[24].mxu1 %v2469_v14 }
 0x61d   : > { %2612 = vmatprep.mubr.bf16.mxu1 %v5139_v9  ;;  %4321 = vmatpush3.bf16.msra.mxu1 %v4699_v4 }
 0x61e   : > { %v4318_v18 = vpop.f32.mrb[28].mxu0  ;;  %4322 = vmatprep.subr.bf16.mxu1 %v4700_v15 }
 0x61f   : > { %v2446_v60 = vpop.f32.mrb[29].mxu0 }
 0x620   : > { %v4319_v28 = vpop.f32.mrb[30].mxu0 }
 0x621   : > { %v2472_v19 = vpack.c.bf16 %v4319_v28, %v4318_v18  ;;  %v2449_v42 = vpop.f32.mrb[31].mxu0  ;;  %4323 = vmatpush3.bf16.msra.mxu1 %v4700_v15 }
 0x622   : > { %v2471_v29 = vpack.c.bf16 %v2449_v42, %v2446_v60  ;;  %4324 = vmatprep.subr.bf16.mxu1 %v4701_v35 }
 0x624   : > { %2613 = vmatmul.mubr.bf16.gmra.mrb[28].mxu1 %v2470_v7 }
 0x625   : > { %2622 = vmatprep.mubr.bf16.mxu1 %v5139_v9  ;;  %4325 = vmatpush3.bf16.msra.mxu1 %v4701_v35 }
 0x626   : > { %4326 = vmatprep.subr.bf16.mxu1 %v4702_v50 }
 0x629   : > { %4327 = vmatpush3.bf16.msra.mxu1 %v4702_v50 }
 0x62a   : > { %4328 = vmatprep.subr.bf16.mxu1 %v4703_v23 }
 0x62c   : > { %2623 = vmatmul.mubr.bf16.gmra.mrb[32].mxu1 %v2471_v29 }
 0x62d   : > { %2632 = vmatprep.mubr.bf16.mxu1 %v5139_v9  ;;  %4329 = vmatpush3.bf16.msra.mxu1 %v4703_v23  ;;  %v5319_v9 = vld [vmem:[#allocation3 + $0x240] sm:$0xff]  }
 0x62e   : > { %4330 = vmatprep.subr.bf16.mxu1 %v4704_v22 }
 0x631   : > { %4331 = vmatpush3.bf16.msra.mxu1 %v4704_v22  ;;  %v2669_v22 = vmul.f32 0.70710677, %v5282_v45 }
 0x632   : > { %4332 = vmatprep.subr.bf16.mxu1 %v4705_v16 }
 0x634   : > { %2633 = vmatmul.mubr.bf16.gmra.mrb[36].mxu1 %v2472_v19 }
 0x635   : > { %4333 = vmatpush3.bf16.msra.mxu1 %v4705_v16 }
 0x636   : > { %4334 = vmatprep.subr.bf16.mxu1 %v4706_v40 }
 0x639   : > { %4335 = vmatpush3.bf16.msra.mxu1 %v4706_v40 }
 0x63a   : > { %4344 = vmatprep.subr.bf16.mxu1 %v5319_v9 }
 0x6ef   : > { %v2604_v53 = vpop.f32.mrb[24].mxu1 }
 0x6f0   : > { %v2656_v55 = vadd.f32 %v5325_v52, %v2604_v53  ;;  %v2606_v57 = vpop.f32.mrb[25].mxu1 }
 0x6f1   : > { %v5330_v48 = vadd.f32 %v2606_v57, %v5233_v12  ;;  %v2608_v54 = vpop.f32.mrb[26].mxu1  ;;  %v2666_v12 = vmul.f32 0.70710677, %v5255_v31  ;;  %v4708_v31 = vld [vmem:[#allocation3 + $0x248] sm:$0xff]   ;;  %v2846_v57 = vrot.slane %v2688_v43, 7  ;;  %v4755_v43 = vld [vmem:[%s5474_s7] sm:$0xff]  }
 0x6f2   : > { %v2672_v30 = vadd.f32 %v2664_v24, %v2656_v55  ;;  %v2657_v61 = vadd.f32 %v5325_v52, %v2608_v54  ;;  %v2610_v63 = vpop.f32.mrb[27].mxu1 }
 0x6f3   : > { %v5335_v0 = vadd.f32 %v2610_v63, %v5240_v25  ;;  %v4715_v63 = vld [vmem:[#allocation3 + $0x2c0] sm:$0xff]  }
 0x6f4   : > { %v2673_v3 = vadd.f32 %v2665_v51, %v2657_v61  ;;  %v4713_v61 = vld [vmem:[#allocation3 + $0x270] sm:$0xff]  }
 0x6f6   : > { %v5337_v4 = vpack.c.bf16 %v2673_v3, %v2672_v30  ;;  %v4716_v3 = vld [vmem:[#allocation3 + $0x2c8] sm:$0xff]  }
 0x6f7   : > { %v2614_v56 = vpop.f32.mrb[28].mxu1 }
 0x6f8   : > { %2684 = vst [vmem:[#allocation2 + $0x8] sm:$0xff] %v5337_v4  ;;  %v2658_v26 = vadd.f32 %v5325_v52, %v2614_v56  ;;  %v2616_v5 = vpop.f32.mrb[29].mxu1  ;;  %4336 = vmatprep.mubr.bf16.mxu1 %v5337_v4  ;;  %v2847_v29 = vrot.slane %v5337_v4, 7 }
 0x6f9   : > { %v5344_v6 = vadd.f32 %v2616_v5, %v5252_v2  ;;  %v2618_v21 = vpop.f32.mrb[30].mxu1  ;;  %v2668_v2 = vmul.f32 0.70710677, %v5276_v27  ;;  %v4709_v27 = vld [vmem:[#allocation3 + $0x250] sm:$0xff]  }
 0x6fa   : > { %v2674_v7 = vadd.f32 %v2666_v12, %v2658_v26  ;;  %v2659_v25 = vadd.f32 %v5325_v52, %v2618_v21  ;;  %v2620_v14 = vpop.f32.mrb[31].mxu1  ;;  %v4717_v26 = vld [vmem:[#allocation3 + $0x2d0] sm:$0xff]   ;;  %v4718_v21 = vld [vmem:[#allocation3 + $0x2d8] sm:$0xff]  }
 0x6fb   : > { %v5349_v15 = vadd.f32 %v2620_v14, %v5260_v36  ;;  %v4720_v14 = vld [vmem:[#allocation3 + $0x2e8] sm:$0xff]  }
 0x6fc   : > { %v2675_v18 = vadd.f32 %v2667_v8, %v2659_v25  ;;  %v4719_v8 = vld [vmem:[#allocation3 + $0x2e0] sm:$0xff]  }
 0x6fe   : > { %v5351_v60 = vpack.c.bf16 %v2675_v18, %v2674_v7  ;;  %v4721_v18 = vld [vmem:[#allocation3 + $0x2f0] sm:$0xff]  }
 0x6ff   : > { %v2624_v28 = vpop.f32.mrb[32].mxu1  ;;  %v2972_v56 = vld [vmem:[#allocation2 + $0x8] sm:$0xfe] }
 0x700   : > { %v2660_v19 = vadd.f32 %v5325_v52, %v2624_v28  ;;  %v2626_v42 = vpop.f32.mrb[33].mxu1  ;;  %4337 = vmatmul.mubr.bf16.vlgmr.msra.gmra.mrb[40].mxu1 %v5351_v60  ;;  %v2849_v17 = vrot.slane %v5351_v60, 7  ;;  %v3000_v20 = vrot.slane %v5351_v60, 1  ;;  %v2999_v5 = vrot.slane %v2972_v56, 1  ;;  %v4722_v60 = vld [vmem:[#allocation3 + $0x2f8] sm:$0xff]  }
 0x701   : > { %v5359_v35 = vadd.f32 %v2626_v42, %v5272_v33  ;;  %v2628_v36 = vpop.f32.mrb[34].mxu1  ;;  %4345 = vmatpush3.bf16.msra.mxu1 %v5319_v9  ;;  %v2670_v9 = vmul.f32 0.70710677, %v5296_v47  ;;  %v4744_v42 = vld [vmem:[#allocation5 + $0x1f0] ss:$8 sps:$4 sm:$0xff]  }
 0x702   : > { %v2676_v50 = vadd.f32 %v2668_v2, %v2660_v19  ;;  %v2661_v23 = vadd.f32 %v5325_v52, %v2628_v36  ;;  %v2630_v16 = vpop.f32.mrb[35].mxu1  ;;  %4346 = vmatprep.subr.bf16.mxu1 %v4708_v31  ;;  %v2850_v40 = vsel %vm1473_vm2, %v2847_v29, %v2849_v17  ;;  %v3001_v25 = vsel %vm1627_vm3, %v2999_v5, %v3000_v20  ;;  %v4746_v2 = vld [vmem:[#allocation5 + $0x1f4] ss:$8 sps:$4 sm:$0xff]  }
 0x703   : > { %v5366_v59 = vadd.f32 %v2630_v16, %v5280_v58  ;;  %3248 = vmatprep.subr.bf16.mxu0 %v4746_v2 }
 0x704   : > { %v2677_v44 = vadd.f32 %v2669_v22, %v2661_v23  ;;  %3249 = vmatpush1.bf16.msra.mxu0 %v4744_v42 }
 0x705   : > { %4347 = vmatpush3.bf16.msra.mxu1 %v4708_v31  ;;  %v2976_v31 = vld [vmem:[#allocation2 + $0x28] sm:$0x1] }
 0x706   : > { %v2682_v33 = vpack.c.bf16 %v2677_v44, %v2676_v50  ;;  %4348 = vmatprep.subr.bf16.mxu1 %v4709_v27  ;;  %v3006_v28 = vrot.slane %v2976_v31, 1 }
 0x707   : > { %v2634_v39 = vpop.f32.mrb[36].mxu1 }
 0x708   : > { %v2662_v62 = vadd.f32 %v5325_v52, %v2634_v39  ;;  %v2636_v1 = vpop.f32.mrb[37].mxu1  ;;  %4340 = vmatprep.mubr.bf16.mxu1 %v2682_v33  ;;  %v2851_v45 = vrot.slane %v2682_v33, 7  ;;  %v3002_v11 = vrot.slane %v2682_v33, 1  ;;  %v4749_v33 = vld [vmem:[%s5473_s6 + $0x10] sm:$0xff]  }
 0x709   : > { %v5372_v41 = vadd.f32 %v2636_v1, %v5293_v13  ;;  %v2638_v58 = vpop.f32.mrb[38].mxu1  ;;  %4349 = vmatpush3.bf16.msra.mxu1 %v4709_v27  ;;  %v4748_v27 = vld [vmem:[%s5473_s6 + $0x8] sm:$0xff]  }
 0x70a   : > { %v2678_v46 = vadd.f32 %v2670_v9, %v2662_v62  ;;  %v2663_v49 = vadd.f32 %v5325_v52, %v2638_v58  ;;  %v2640_v47 = vpop.f32.mrb[39].mxu1  ;;  %4350 = vmatprep.subr.bf16.mxu1 %v4710_v38  ;;  %v2852_v53 = vsel %vm1473_vm2, %v2849_v17, %v2851_v45  ;;  %v3003_v55 = vsel %vm1627_vm3, %v3000_v20, %v3002_v11  ;;  %v4751_v20 = vld [vmem:[%s5473_s6 + $0x20] sm:$0xff]   ;;  %v4753_v58 = vld [vmem:[%s5473_s6 + $0x30] sm:$0xff]  }
 0x70b   : > { %v5379_v24 = vadd.f32 %v2640_v47, %v5300_v34  ;;  %v2848_v52 = vsel %vm1473_vm2, %v2846_v57, %v2847_v29  ;;  %v4714_v34 = vld [vmem:[#allocation3 + $0x278] sm:$0xff]   ;;  %v4747_v29 = vld [vmem:[%s5473_s6] sm:$0xff]   ;;  %v4758_v47 = vld [vmem:[%s5474_s7 + $0x18] sm:$0xff]  }
 0x70c   : > { %v2679_v13 = vadd.f32 %v2671_v10, %v2663_v49  ;;  %4392 = vmatprep.subr.bf16.mxu0 %v4747_v29  ;;  %v4754_v10 = vld [vmem:[%s5473_s6 + $0x38] sm:$0xff]   ;;  %v4757_v49 = vld [vmem:[%s5474_s7 + $0x10] sm:$0xff]  }
 0x70d   : > { %4351 = vmatpush3.bf16.msra.mxu1 %v4710_v38 }
 0x70e   : > { %v2683_v54 = vpack.c.bf16 %v2679_v13, %v2678_v46  ;;  %4352 = vmatprep.subr.bf16.mxu1 %v4711_v32  ;;  %v4756_v46 = vld [vmem:[%s5474_s7 + $0x8] sm:$0xff]   ;;  %v3913_v13 = vld [vmem:[%s5469_s2 + $0x1] ss:$0 sm:$0xff] }
 0x710   : > { %2687 = vst [vmem:[#allocation2 + $0x20] sm:$0xff] %v2683_v54  ;;  %4341 = vmatmul.mubr.bf16.gmra.mrb[44].mxu1 %v2683_v54  ;;  %v3004_v30 = vrot.slane %v2683_v54, 1 }
 0x711   : > { %4353 = vmatpush3.bf16.msra.mxu1 %v4711_v32  ;;  %4360 = vmatprep.mubr.bf16.mxu1 %v2848_v52  ;;  %v4759_v32 = vld [vmem:[%s5474_s7 + $0x20] sm:$0xff]  }
 0x712   : > { %4354 = vmatprep.subr.bf16.mxu1 %v4712_v37  ;;  %v3005_v51 = vsel %vm1627_vm3, %v3002_v11, %v3004_v30  ;;  %v3007_v19 = vsel %vm1627_vm3, %v3004_v30, %v3006_v28  ;;  %v4752_v11 = vld [vmem:[%s5473_s6 + $0x28] sm:$0xff]  }
 0x715   : > { %4355 = vmatpush3.bf16.msra.mxu1 %v4712_v37 }
 0x716   : > { %4356 = vmatprep.subr.bf16.mxu1 %v4713_v61 }
 0x717   : > { %v2692_v4 = vld [vmem:[#allocation2 + $0x20] sm:$0x7f] }
 0x718   : > { %v2853_v12 = vrot.slane %v2692_v4, 7 }
 0x719   : > { %4357 = vmatpush3.bf16.msra.mxu1 %v4713_v61 }
 0x71a   : > { %4358 = vmatprep.subr.bf16.mxu1 %v4714_v34  ;;  %v2854_v7 = vsel %vm1473_vm2, %v2851_v45, %v2853_v12  ;;  %v4750_v45 = vld [vmem:[%s5473_s6 + $0x18] sm:$0xff]  }
 0x71d   : > { %4359 = vmatpush3.bf16.msra.mxu1 %v4714_v34 }
 0x71e   : > { %4368 = vmatprep.subr.bf16.mxu1 %v4715_v63 }
 0x720   : > { %4361 = vmatmul.mubr.bf16.vlgmr.msra.gmra.mrb[40].mxu1 %v2850_v40  ;;  %v4764_v40 = vld [vmem:[#allocation2] sm:$0xff] }
 0x721   : > { %4364 = vmatprep.mubr.bf16.mxu1 %v2852_v53  ;;  %4369 = vmatpush3.bf16.msra.mxu1 %v4715_v63 }
 0x722   : > { %4370 = vmatprep.subr.bf16.mxu1 %v4716_v3 }
 0x725   : > { %4371 = vmatpush3.bf16.msra.mxu1 %v4716_v3 }
 0x726   : > { %4372 = vmatprep.subr.bf16.mxu1 %v4717_v26 }
 0x728   : > { %4365 = vmatmul.mubr.bf16.gmra.mrb[44].mxu1 %v2854_v7 }
 0x729   : > { %4373 = vmatpush3.bf16.msra.mxu1 %v4717_v26  ;;  %4384 = vmatprep.mubr.bf16.mxu1 %v3001_v25 }
 0x72a   : > { %4374 = vmatprep.subr.bf16.mxu1 %v4718_v21 }
 0x72d   : > { %4375 = vmatpush3.bf16.msra.mxu1 %v4718_v21 }
 0x72e   : > { %4376 = vmatprep.subr.bf16.mxu1 %v4719_v8 }
 0x731   : > { %4377 = vmatpush3.bf16.msra.mxu1 %v4719_v8 }
 0x732   : > { %4378 = vmatprep.subr.bf16.mxu1 %v4720_v14 }
 0x735   : > { %4379 = vmatpush3.bf16.msra.mxu1 %v4720_v14 }
 0x736   : > { %4380 = vmatprep.subr.bf16.mxu1 %v4721_v18 }
 0x739   : > { %4381 = vmatpush3.bf16.msra.mxu1 %v4721_v18 }
 0x73a   : > { %4382 = vmatprep.subr.bf16.mxu1 %v4722_v60 }
 0x73d   : > { %4383 = vmatpush3.bf16.msra.mxu1 %v4722_v60 }
 0x73e   : > { %4416 = vmatprep.subr.bf16.mxu1 %v4755_v43 }
 0x740   : > { %4385 = vmatmul.mubr.bf16.vlgmr.msra.gmra.mrb[40].mxu1 %v3003_v55 }
 0x741   : > { %4388 = vmatprep.mubr.bf16.mxu1 %v3005_v51  ;;  %4417 = vmatpush3.bf16.msra.mxu1 %v4755_v43 }
 0x742   : > { %4418 = vmatprep.subr.bf16.mxu1 %v4756_v46 }
 0x745   : > { %4419 = vmatpush3.bf16.msra.mxu1 %v4756_v46 }
 0x746   : > { %4420 = vmatprep.subr.bf16.mxu1 %v4757_v49 }
 0x748   : > { %4389 = vmatmul.mubr.bf16.gmra.mrb[44].mxu1 %v3007_v19 }
 0x749   : > { %4421 = vmatpush3.bf16.msra.mxu1 %v4757_v49 }
 0x74a   : > { %4422 = vmatprep.subr.bf16.mxu1 %v4758_v47 }
 0x74d   : > { %4423 = vmatpush3.bf16.msra.mxu1 %v4758_v47 }
 0x74e   : > { %4424 = vmatprep.subr.bf16.mxu1 %v4759_v32 }
 0x751   : > { %4425 = vmatpush3.bf16.msra.mxu1 %v4759_v32 }
 0x813   : > { %v4386_v17 = vpop.f32.mrb[40].mxu1 }
 0x814   : > { %v3094_v36 = vpop.f32.mrb[41].mxu1 }
 0x815   : > { %v4387_v50 = vpop.f32.mrb[42].mxu1 }
 0x816   : > { %v3134_v23 = vpack.c.bf16 %v4387_v50, %v4386_v17  ;;  %v3097_v22 = vpop.f32.mrb[43].mxu1 }
 0x817   : > { %v3133_v16 = vpack.c.bf16 %v3097_v22, %v3094_v36 }
 0x819   : > { %3267 = vmatmul.mubr.bf16.vlgmr.msra.gmra.mrb[32].mxu0 %v3133_v16 }
 0x81a   : > { %3274 = vmatprep.mubr.bf16.mxu0 %v4764_v40  ;;  %4393 = vmatpush3.bf16.msra.mxu0 %v4747_v29 }
 0x81b   : > { %v4390_v44 = vpop.f32.mrb[44].mxu1  ;;  %4394 = vmatprep.subr.bf16.mxu0 %v4748_v27 }
 0x81c   : > { %v3110_v38 = vpop.f32.mrb[45].mxu1 }
 0x81d   : > { %v4391_v39 = vpop.f32.mrb[46].mxu1 }
 0x81e   : > { %v3136_v9 = vpack.c.bf16 %v4391_v39, %v4390_v44  ;;  %v3113_v62 = vpop.f32.mrb[47].mxu1  ;;  %4395 = vmatpush3.bf16.msra.mxu0 %v4748_v27 }
 0x81f   : > { %v3135_v1 = vpack.c.bf16 %v3113_v62, %v3110_v38  ;;  %4396 = vmatprep.subr.bf16.mxu0 %v4749_v33 }
 0x821   : > { %3275 = vmatmul.mubr.bf16.gmra.mrb[36].mxu0 %v3134_v23 }
 0x822   : > { %3282 = vmatprep.mubr.bf16.mxu0 %v4764_v40  ;;  %4397 = vmatpush3.bf16.msra.mxu0 %v4749_v33 }
 0x823   : > { %4398 = vmatprep.subr.bf16.mxu0 %v4750_v45 }
 0x826   : > { %4399 = vmatpush3.bf16.msra.mxu0 %v4750_v45 }
 0x827   : > { %4400 = vmatprep.subr.bf16.mxu0 %v4751_v20 }
 0x829   : > { %3283 = vmatmul.mubr.bf16.gmra.mrb[40].mxu0 %v3135_v1 }
 0x82a   : > { %3290 = vmatprep.mubr.bf16.mxu0 %v4764_v40  ;;  %4401 = vmatpush3.bf16.msra.mxu0 %v4751_v20  ;;  %v4762_v20 = vld [vmem:[%s5474_s7 + $0x38] sm:$0xff]  }
 0x82b   : > { %4402 = vmatprep.subr.bf16.mxu0 %v4752_v11 }
 0x82e   : > { %4403 = vmatpush3.bf16.msra.mxu0 %v4752_v11  ;;  %v3914_v11 = vld [vmem:[%s5469_s2 + $0x2] ss:$0 sm:$0xff] }
 0x82f   : > { %4404 = vmatprep.subr.bf16.mxu0 %v4753_v58 }
 0x831   : > { %3291 = vmatmul.mubr.bf16.gmra.mrb[44].mxu0 %v3136_v9 }
 0x832   : > { %4405 = vmatpush3.bf16.msra.mxu0 %v4753_v58 }
 0x833   : > { %4406 = vmatprep.subr.bf16.mxu0 %v4754_v10 }
 0x836   : > { %4407 = vmatpush3.bf16.msra.mxu0 %v4754_v10 }
 0x8ec   : > { %v3268_v53 = vpop.f32.mrb[32].mxu0 }
 0x8ed   : > { %v3269_v55 = vpop.f32.mrb[33].mxu0 }
 0x8ee   : > { %v3299_v57 = vadd.f32 %v3269_v55, %v5330_v48  ;;  %v3271_v54 = vpop.f32.mrb[34].mxu0 }
 0x8ef   : > { %v3272_v37 = vpop.f32.mrb[35].mxu0 }
 0x8f0   : > { %v3312_v52 = vadd.f32 %v3913_v13, %v3299_v57  ;;  %v3300_v30 = vadd.f32 %v3272_v37, %v5335_v0 }
 0x8f2   : > { %v3328_v61 = vmul.f32 0.2, %v3312_v52  ;;  %v3313_v51 = vadd.f32 %v3913_v13, %v3300_v30  ;;  %vm3320_vm4 = vcmp.ge.f32.partialorder %v3312_v52, 0.0 }
 0x8f4   : > { %vm3321_vm5 = vcmp.ge.f32.partialorder %v3313_v51, 0.0  ;;  %v3329_v34 = vmul.f32 0.2, %v3313_v51  ;;  %v3276_v63 = vpop.f32.mrb[36].mxu0  ;;  %v3336_v26 = vsel %vm3320_vm4, %v3312_v52, %v3328_v61  ;;  %vm3646_vm4 = vcmask 31744  }
 0x8f5   : > { %v3277_v3 = vpop.f32.mrb[37].mxu0 }
 0x8f6   : > { %v3301_v4 = vadd.f32 %v3277_v3, %v5344_v6  ;;  %v3279_v56 = vpop.f32.mrb[38].mxu0  ;;  %v3337_v12 = vsel %vm3321_vm5, %v3313_v51, %v3329_v34 }
 0x8f7   : > { %v3280_v5 = vpop.f32.mrb[39].mxu0  ;;  %v3344_v21 = vpack.c.bf16 %v3337_v12, %v3336_v26 }
 0x8f8   : > { %v3314_v48 = vadd.f32 %v3913_v13, %v3301_v4  ;;  %v3302_v7 = vadd.f32 %v3280_v5, %v5349_v15 }
 0x8f9   : > { %4408 = vmatprep.mubr.bf16.mxu0 %v3344_v21 }
 0x8fa   : > { %v3330_v25 = vmul.f32 0.2, %v3314_v48  ;;  %v3315_v0 = vadd.f32 %v3913_v13, %v3302_v7  ;;  %vm3322_vm6 = vcmp.ge.f32.partialorder %v3314_v48, 0.0 }
 0x8fc   : > { %vm3323_vm7 = vcmp.ge.f32.partialorder %v3315_v0, 0.0  ;;  %v3331_v8 = vmul.f32 0.2, %v3315_v0  ;;  %v3284_v14 = vpop.f32.mrb[40].mxu0  ;;  %v3338_v60 = vsel %vm3322_vm6, %v3314_v48, %v3330_v25 }
 0x8fd   : > { %v3285_v18 = vpop.f32.mrb[41].mxu0 }
 0x8fe   : > { %v3339_v31 = vsel %vm3323_vm7, %v3315_v0, %v3331_v8  ;;  %v3303_v6 = vadd.f32 %v3285_v18, %v5359_v35  ;;  %v3287_v28 = vpop.f32.mrb[42].mxu0 }
 0x8ff   : > { %v3345_v19 = vpack.c.bf16 %v3339_v31, %v3338_v60  ;;  %v3288_v2 = vpop.f32.mrb[43].mxu0  ;;  %v3923_v28 = vld [vmem:[%s5475_s8] ss:$0 sm:$0xff] }
 0x900   : > { %v3316_v42 = vadd.f32 %v3913_v13, %v3303_v6  ;;  %v3304_v29 = vadd.f32 %v3288_v2, %v5366_v59 }
 0x901   : > { %4409 = vmatmul.mubr.bf16.vlgmr.msra.gmra.mrb[48].mxu0 %v3345_v19 }
 0x902   : > { %v3332_v15 = vmul.f32 0.2, %v3316_v42  ;;  %v3317_v17 = vadd.f32 %v3913_v13, %v3304_v29  ;;  %vm3324_vm8 = vcmp.ge.f32.partialorder %v3316_v42, 0.0 }
 0x904   : > { %vm3325_vm9 = vcmp.ge.f32.partialorder %v3317_v17, 0.0  ;;  %v3333_v36 = vmul.f32 0.2, %v3317_v17  ;;  %v3292_v50 = vpop.f32.mrb[44].mxu0  ;;  %v3340_v27 = vsel %vm3324_vm8, %v3316_v42, %v3332_v15 }
 0x905   : > { %v3293_v23 = vpop.f32.mrb[45].mxu0 }
 0x906   : > { %v3305_v22 = vadd.f32 %v3293_v23, %v5372_v41  ;;  %v3295_v16 = vpop.f32.mrb[46].mxu0  ;;  %v3341_v40 = vsel %vm3325_vm9, %v3317_v17, %v3333_v36  ;;  %v4760_v41 = vld [vmem:[%s5474_s7 + $0x28] sm:$0xff]  }
 0x907   : > { %v3296_v35 = vpop.f32.mrb[47].mxu0  ;;  %v3346_v44 = vpack.c.bf16 %v3341_v40, %v3340_v27  ;;  %4426 = vmatprep.subr.bf16.mxu1 %v4760_v41 }
 0x908   : > { %v3318_v33 = vadd.f32 %v3913_v13, %v3305_v22  ;;  %v3306_v38 = vadd.f32 %v3296_v35, %v5379_v24  ;;  %4427 = vmatpush3.bf16.msra.mxu1 %v4760_v41  ;;  %v4761_v24 = vld [vmem:[%s5474_s7 + $0x30] sm:$0xff]  }
 0x909   : > { %4412 = vmatprep.mubr.bf16.mxu0 %v3346_v44  ;;  %4428 = vmatprep.subr.bf16.mxu1 %v4761_v24 }
 0x90a   : > { %v3334_v59 = vmul.f32 0.2, %v3318_v33  ;;  %v3319_v39 = vadd.f32 %v3913_v13, %v3306_v38  ;;  %vm3326_vm10 = vcmp.ge.f32.partialorder %v3318_v33, 0.0 }
 0x90c   : > { %vm3327_vm11 = vcmp.ge.f32.partialorder %v3319_v39, 0.0  ;;  %v3335_v9 = vmul.f32 0.2, %v3319_v39  ;;  %v3342_v62 = vsel %vm3326_vm10, %v3318_v33, %v3334_v59  ;;  %4429 = vmatpush3.bf16.msra.mxu1 %v4761_v24 }
 0x90d   : > { %4430 = vmatprep.subr.bf16.mxu1 %v4762_v20 }
 0x90e   : > { %v3343_v1 = vsel %vm3327_vm11, %v3319_v39, %v3335_v9 }
 0x90f   : > { %v3347_v45 = vpack.c.bf16 %v3343_v1, %v3342_v62 }
 0x910   : > { %4431 = vmatpush3.bf16.msra.mxu1 %v4762_v20 }
 0x911   : > { %4413 = vmatmul.mubr.bf16.gmra.mrb[52].mxu0 %v3347_v45 }
 0x9d4   : > { %v4410_v58 = vpop.f32.mrb[48].mxu0 }
 0x9d5   : > { %v3460_v10 = vadd.f32 %v4410_v58, %v3914_v11  ;;  %v3451_v43 = vpop.f32.mrb[49].mxu0 }
 0x9d6   : > { %v3452_v46 = vadd.f32 %v3914_v11, %v3451_v43  ;;  %v4411_v49 = vpop.f32.mrb[50].mxu0 }
 0x9d7   : > { %v3492_v47 = vmul.f32 0.2, %v3460_v10  ;;  %v3463_v32 = vadd.f32 %v4411_v49, %v3914_v11  ;;  %v3454_v53 = vpop.f32.mrb[51].mxu0  ;;  %vm3484_vm12 = vcmp.ge.f32.partialorder %v3460_v10, 0.0 }
 0x9d8   : > { %v3490_v55 = vmul.f32 0.2, %v3452_v46  ;;  %v3455_v13 = vadd.f32 %v3914_v11, %v3454_v53  ;;  %vm3482_vm13 = vcmp.ge.f32.partialorder %v3452_v46, 0.0 }
 0x9d9   : > { %vm3485_vm14 = vcmp.ge.f32.partialorder %v3463_v32, 0.0  ;;  %v3493_v57 = vmul.f32 0.2, %v3463_v32  ;;  %v3500_v37 = vsel %vm3484_vm12, %v3460_v10, %v3492_v47 }
 0x9da   : > { %vm3483_vm15 = vcmp.ge.f32.partialorder %v3455_v13, 0.0  ;;  %v3491_v54 = vmul.f32 0.2, %v3455_v13  ;;  %v3498_v61 = vsel %vm3482_vm13, %v3452_v46, %v3490_v55 }
 0x9db   : > { %v3501_v52 = vsel %vm3485_vm14, %v3463_v32, %v3493_v57 }
 0x9dc   : > { %v3507_v30 = vpack.c.bf16 %v3501_v52, %v3500_v37  ;;  %v3499_v51 = vsel %vm3483_vm15, %v3455_v13, %v3491_v54 }
 0x9dd   : > { %v3506_v34 = vpack.c.bf16 %v3499_v51, %v3498_v61 }
 0x9df   : > { %4432 = vmatprep.mubr.bf16.mxu1 %v3506_v34 }
 0x9e0   : > { %4433 = vmatmul.mubr.bf16.vlgmr.msra.gmra.mrb[48].mxu1 %v3507_v30 }
 0x9e4   : > { %v4414_v63 = vpop.f32.mrb[52].mxu0 }
 0x9e5   : > { %v3476_v3 = vadd.f32 %v4414_v63, %v3914_v11  ;;  %v3467_v4 = vpop.f32.mrb[53].mxu0 }
 0x9e6   : > { %v3468_v56 = vadd.f32 %v3914_v11, %v3467_v4  ;;  %v4415_v26 = vpop.f32.mrb[54].mxu0 }
 0x9e7   : > { %v3496_v12 = vmul.f32 0.2, %v3476_v3  ;;  %v3479_v5 = vadd.f32 %v4415_v26, %v3914_v11  ;;  %v3470_v21 = vpop.f32.mrb[55].mxu0  ;;  %vm3488_vm0 = vcmp.ge.f32.partialorder %v3476_v3, 0.0 }
 0x9e8   : > { %v3494_v48 = vmul.f32 0.2, %v3468_v56  ;;  %v3471_v7 = vadd.f32 %v3914_v11, %v3470_v21  ;;  %vm3486_vm1 = vcmp.ge.f32.partialorder %v3468_v56, 0.0 }
 0x9e9   : > { %vm3489_vm2 = vcmp.ge.f32.partialorder %v3479_v5, 0.0  ;;  %v3497_v25 = vmul.f32 0.2, %v3479_v5  ;;  %v3504_v8 = vsel %vm3488_vm0, %v3476_v3, %v3496_v12 }
 0x9ea   : > { %vm3487_vm3 = vcmp.ge.f32.partialorder %v3471_v7, 0.0  ;;  %v3495_v0 = vmul.f32 0.2, %v3471_v7  ;;  %v3502_v18 = vsel %vm3486_vm1, %v3468_v56, %v3494_v48 }
 0x9eb   : > { %v3505_v14 = vsel %vm3489_vm2, %v3479_v5, %v3497_v25 }
 0x9ec   : > { %v3503_v60 = vsel %vm3487_vm3, %v3471_v7, %v3495_v0  ;;  %v3509_v31 = vpack.c.bf16 %v3505_v14, %v3504_v8 }
 0x9ed   : > { %v3508_v6 = vpack.c.bf16 %v3503_v60, %v3502_v18 }
 0x9ef   : > { %4436 = vmatprep.mubr.bf16.mxu1 %v3508_v6 }
 0x9f0   : > { %4437 = vmatmul.mubr.bf16.gmra.mrb[52].mxu1 %v3509_v31 }
 0xab3   : > { %v4434_v19 = vpop.f32.mrb[48].mxu1 }
 0xab4   : > { %v3624_v2 = vadd.f32 %v4434_v19, %v3923_v28  ;;  %v3615_v42 = vpop.f32.mrb[49].mxu1 }
 0xab5   : > { %v3616_v29 = vadd.f32 %v3923_v28, %v3615_v42  ;;  %v4435_v15 = vpop.f32.mrb[50].mxu1 }
 0xab6   : > { %3649 = vst.msk [vmem:[%s362_s28 + $0x10] sm:$0xff] %vm3646_vm4, %v3624_v2  ;;  %v3627_v17 = vadd.f32 %v4435_v15, %v3923_v28  ;;  %v3618_v36 = vpop.f32.mrb[51].mxu1 }
 0xab7   : > { %3647 = vst.msk [vmem:[%s362_s28] sm:$0xff] %vm3646_vm4, %v3616_v29  ;;  %v3619_v50 = vadd.f32 %v3923_v28, %v3618_v36 }
 0xab8   : > { %3650 = vst.msk [vmem:[%s362_s28 + $0x18] sm:$0xff] %vm3646_vm4, %v3627_v17 }
 0xab9   : > { %3648 = vst.msk [vmem:[%s362_s28 + $0x8] sm:$0xff] %vm3646_vm4, %v3619_v50 }
 0xac3   : > { %v4438_v23 = vpop.f32.mrb[52].mxu1 }
 0xac4   : > { %v3640_v22 = vadd.f32 %v4438_v23, %v3923_v28  ;;  %v3631_v16 = vpop.f32.mrb[53].mxu1 }
 0xac5   : > { %v3632_v27 = vadd.f32 %v3923_v28, %v3631_v16  ;;  %v4439_v40 = vpop.f32.mrb[54].mxu1 }
 0xac6   : > { %3653 = vst.msk [vmem:[%s362_s28 + $0x30] sm:$0xff] %vm3646_vm4, %v3640_v22  ;;  %v3643_v35 = vadd.f32 %v4439_v40, %v3923_v28  ;;  %v3634_v44 = vpop.f32.mrb[55].mxu1 }
 0xac7   : > { %3651 = vst.msk [vmem:[%s362_s28 + $0x20] sm:$0xff] %vm3646_vm4, %v3632_v27  ;;  %v3635_v33 = vadd.f32 %v3923_v28, %v3634_v44 }
 0xac8   : > { %3654 = vst.msk [vmem:[%s362_s28 + $0x38] sm:$0xff] %vm3646_vm4, %v3643_v35 }
 0xac9   : > { %3652 = vst.msk [vmem:[%s362_s28 + $0x28] sm:$0xff] %vm3646_vm4, %v3635_v33 }
 0xaca PF: > { %s21_s30 = sadd.s32 1, %s4835_s30  }
 0xacb   : > { %p18_p5 = scmp.ge.s32.totalorder %s21_s30, 4  }
 0xacd   :  { %20 = sbr.rel (!%p18_p5) target bundleno = 2 (0x2), region = 109 }
 0xad4   :  { %3676 = vsyncpa [#allocation4], 1 }
 0xad5   :  { %3678 = vsyncpa [#allocation4 + $0x1], 1 }
 0xad6   :  { %3679 = vsyncpa [#allocation6], 1 }

</bundles_post_ra>
